<compile_context>
chip_gen: v7x
topology: tpu7x:2x2x1
jax: 0.10.0
libtpu: 0.0.40
codegen_flags: <defaults>
</compile_context>

<pallas_src>
import jax
import jax.numpy as jnp
from jax.experimental import pallas as pl
from jax.experimental.pallas import tpu as pltpu


# ----------------------------------------------------------------------------
# Pallas kernel: fused  y = relu(x @ W1 + b1) @ W2 + b2
#   x_ref  : (TILE_B, K)   input dtype (cast to operand dtype after DMA)
#   w1_ref : (K, H)        operand dtype (VMEM-resident, single-buffered)
#   b1_ref : (1, H)        f32           (VMEM-resident)
#   w2_ref : (H, N)        operand dtype (VMEM-resident)
#   b2_ref : (1, N)        f32           (VMEM-resident)
#   o_ref  : (TILE_B, N)   out dtype
# ----------------------------------------------------------------------------
def _mlp_kernel(x_ref, w1_ref, b1_ref, w2_ref, b2_ref, o_ref):
    x = x_ref[...]
    if x.dtype != w1_ref.dtype:
        x = x.astype(w1_ref.dtype)  # in-VMEM cast after the DMA (no extra HBM pass)

    # Layer 1: MXU matmul with f32 accumulation; bias + ReLU in f32 on the VPU.
    # (1, H) bias row-broadcasts implicitly in the add -- no materialization.
    h = jnp.dot(x, w1_ref[...], preferred_element_type=jnp.float32)
    h = jnp.maximum(h + b1_ref[...], 0.0)

    # Layer 2: cast the activation to the operand dtype for the MXU, acc f32.
    y = jnp.dot(h.astype(w2_ref.dtype), w2_ref[...],
                preferred_element_type=jnp.float32)
    o_ref[...] = (y + b2_ref[...]).astype(o_ref.dtype)


def _pick_tile_b(batch: int) -> int:
    """Prefer 256/512-row tiles (MXU fill + step-overhead amortization) but keep
    >= 4 grid steps when the batch allows so v7x's two TensorCores both get
    pipelined work."""
    for tb in (512, 256):
        if batch % tb == 0 and batch // tb >= 4:
            return tb
    for tb in (512, 256, 128, 64, 32, 16, 8):
        if batch % tb == 0:
            return tb
    return batch


def _resident_spec(shape, single_buffer: bool) -> pl.BlockSpec:
    """BlockSpec for a grid-invariant (VMEM-resident) operand."""
    index_map = lambda i: (0,) * len(shape)
    if single_buffer:
        # Constant index_map -> never re-DMA'd; double buffering is pure waste.
        return pl.BlockSpec(shape, index_map, pipeline_mode=pl.Buffered(1))
    return pl.BlockSpec(shape, index_map)


def mlp_forward_pallas(x, w1, b1, w2, b2, *, tile_b=None, out_dtype=jnp.float32):
    """Fused MLP forward, tiled over the batch dimension.

    Expects: feature dims multiples of 128, batch a multiple of tile_b
    (multiple of 8).  `w1`/`w2` should already be stored in the desired MXU
    operand dtype (bf16 recommended); `b1`/`b2` are f32.  Weights stay
    VMEM-resident across grid steps; activation/output tiles are
    double-buffered by BlockSpec auto-pipelining.
    """
    batch, in_f = x.shape
    hidden = w1.shape[1]
    out_f = w2.shape[1]
    if tile_b is None:
        tile_b = _pick_tile_b(batch)
    assert batch % tile_b == 0 and tile_b % 8 == 0, "batch/tile_b must align to 8"
    assert in_f % 128 == 0 and hidden % 128 == 0 and out_f % 128 == 0, (
        "feature dims must be lane-aligned (multiples of 128)")

    b1_2d = b1.reshape(1, hidden).astype(jnp.float32)
    b2_2d = b2.reshape(1, out_f).astype(jnp.float32)

    w_itemsize = jnp.dtype(w1.dtype).itemsize
    x_itemsize = jnp.dtype(x.dtype).itemsize
    o_itemsize = jnp.dtype(out_dtype).itemsize

    # --- VMEM footprint: single-buffered resident weights + double-buffered
    #     activation/output tiles.  Sized against v7x's 64 MiB physical VMEM.
    resident_bytes = (in_f * hidden + hidden * out_f) * w_itemsize \
        + (hidden + out_f) * 4
    tile_bytes = 2 * tile_b * in_f * x_itemsize + 2 * tile_b * out_f * o_itemsize
    total_vmem = resident_bytes + tile_bytes
    if total_vmem > (48 << 20):
        # TODO(synk): add a K-tiled path (hidden-dim grid axis marked
        # "arbitrary" + f32 VMEM accumulator with pl.when init/finalize) for
        # widths whose resident weights exceed the v7x VMEM budget.
        raise NotImplementedError(
            "resident-weight path exceeds VMEM budget; K-tiled path needed")
    vmem_limit = int(min(max(2 * total_vmem + (4 << 20), 32 << 20), 64 << 20))

    grid = (pl.cdiv(batch, tile_b),)

    flops = 2 * batch * (in_f * hidden + hidden * out_f)
    bytes_accessed = (
        batch * in_f * x_itemsize                     # x
        + (in_f * hidden + hidden * out_f) * w_itemsize  # weights
        + (hidden + out_f) * 4                        # biases (f32)
        + batch * out_f * o_itemsize                  # output
    )

    def _run(single_buffer_weights: bool):
        return pl.pallas_call(
            _mlp_kernel,
            out_shape=jax.ShapeDtypeStruct((batch, out_f), out_dtype),
            grid_spec=pltpu.PrefetchScalarGridSpec(
                num_scalar_prefetch=0,
                grid=grid,
                in_specs=[
                    pl.BlockSpec((tile_b, in_f), lambda i: (i, 0)),        # x tile
                    _resident_spec((in_f, hidden), single_buffer_weights),  # w1
                    _resident_spec((1, hidden), single_buffer_weights),     # b1
                    _resident_spec((hidden, out_f), single_buffer_weights), # w2
                    _resident_spec((1, out_f), single_buffer_weights),      # b2
                ],
                out_specs=pl.BlockSpec((tile_b, out_f), lambda i: (i, 0)),
            ),
            compiler_params=pltpu.CompilerParams(
                dimension_semantics=("parallel",),   # v7x: shard tiles over 2 TCs
                vmem_limit_bytes=vmem_limit),
            cost_estimate=pl.CostEstimate(
                flops=flops, transcendentals=0, bytes_accessed=bytes_accessed),
        )(x, w1, b1_2d, w2, b2_2d)

    try:
        return _run(True)
    except Exception:
        # Fallback if this Pallas build rejects pipeline_mode=pl.Buffered(1);
        # only costs the extra (double-buffered) weight VMEM footprint.
        return _run(False)


# ----------------------------------------------------------------------------
# Python-side mirror of ParamBucket / DDPWrapper (bookkeeping only; forward
# math is delegated to the Pallas kernel above).  Bookkeeping mirrors the
# reference PyTorch code exactly, including its `is_empty` quirk.
# ----------------------------------------------------------------------------
class ParamBucket:
    def __init__(self, max_size: int):
        self.params = []
        self.max_size = max_size
        self.cur_size = 0
        self.back_propped = 0
        self.handle = None

    def add_param(self, name, param):
        self.params.append((name, param))
        self.cur_size += param.size * param.dtype.itemsize

    def is_full(self):
        return self.cur_size >= self.max_size

    def is_empty(self):
        # Reproduced verbatim from the reference module (it actually returns
        # "is not empty"); kept for bookkeeping parity with the spec.
        return self.cur_size > 0

    def prepare_back_prop(self):
        self.back_propped = 0
        self.handle = None


class DDPWrapperPallas:
    """Single-device analogue of DDPWrapper wrapping a 2-layer MLP.

    world_size == 1 -> dist.broadcast of params/buffers is the identity and
    the gradient all-reduce / world_size is a no-op.  The forward pass is
    exactly the wrapped module's forward, run as a fused Pallas kernel.

    Precision knob: `operand_dtype` controls the one-time dtype the MXU
    operands (W1/W2) are stored in at construction (bf16 by default; pass
    jnp.float32 for exact module numerics).  Biases stay f32.
    """

    def __init__(self, params: dict, bucket_size_byte: int = 4,
                 operand_dtype=jnp.bfloat16, out_dtype=jnp.float32):
        self.out_dtype = out_dtype
        # One-time conversion at "broadcast time" -- no per-call casts later.
        self.params = {
            "w1": jnp.asarray(params["w1"], dtype=operand_dtype),
            "b1": jnp.asarray(params["b1"], dtype=jnp.float32),
            "w2": jnp.asarray(params["w2"], dtype=operand_dtype),
            "b2": jnp.asarray(params["b2"], dtype=jnp.float32),
        }
        self.buffers = {}  # the wrapped MLP has no buffers
        self.buckets = []
        self.param2bucket = {}

        # dist.broadcast(param, src=0) is identity with world_size == 1.
        # TODO(synk): a real multi-device param broadcast / grad all-reduce
        # would use pltpu.make_async_remote_copy + barrier semaphores with
        # CompilerParams(collective_id=...); omitted for single-device run.
        bucket = ParamBucket(bucket_size_byte)
        self.buckets.append(bucket)
        for name, p in self.params.items():
            self.param2bucket[name] = bucket
            bucket.add_param(name, p)
            if bucket.is_full():
                bucket = ParamBucket(bucket_size_byte)
                self.buckets.append(bucket)
        if not bucket.is_empty():
            self.buckets.append(bucket)

    def forward(self, x):
        for bucket in self.buckets:
            bucket.prepare_back_prop()
        out = mlp_forward_pallas(
            x,
            self.params["w1"], self.params["b1"],
            self.params["w2"], self.params["b2"],
            out_dtype=self.out_dtype,
        )
        # broadcast buffers (none; identity for world_size == 1)
        return out

    def finish_gradient_synchronization(self):
        # all-reduce(grad) / world_size with world_size == 1 -> no-op
        pass


# ----------------------------------------------------------------------------
# References (plain JAX) for correctness checking
# ----------------------------------------------------------------------------
def mlp_forward_ref_bf16(x, w1, b1, w2, b2):
    """Mirrors the kernel's bf16-operand / f32-accumulate numerics."""
    h = jnp.dot(x.astype(jnp.bfloat16), w1.astype(jnp.bfloat16),
                preferred_element_type=jnp.float32) + b1.reshape(1, -1)
    h = jnp.maximum(h, 0.0)
    return jnp.dot(h.astype(jnp.bfloat16), w2.astype(jnp.bfloat16),
                   preferred_element_type=jnp.float32) + b2.reshape(1, -1)


def mlp_forward_ref_f32(x, w1, b1, w2, b2):
    h = jnp.maximum(x @ w1 + b1, 0.0)
    return h @ w2 + b2


if __name__ == "__main__":
    key = jax.random.PRNGKey(0)
    # Lane-aligned shapes: features multiples of 128; batch big enough for the
    # tile picker to choose tile_b=256 with 4 pipelined grid steps.
    batch, in_features, hidden, out_features = 1024, 128, 256, 128

    kx, k1, k2, k3, k4 = jax.random.split(key, 5)
    x = jax.random.normal(kx, (batch, in_features), dtype=jnp.float32)
    w1 = jax.random.normal(k1, (in_features, hidden), dtype=jnp.float32) * 0.1
    b1 = jax.random.normal(k2, (hidden,), dtype=jnp.float32) * 0.1
    w2 = jax.random.normal(k3, (hidden, out_features), dtype=jnp.float32) * 0.1
    b2 = jax.random.normal(k4, (out_features,), dtype=jnp.float32) * 0.1

    ddp = DDPWrapperPallas(
        {"w1": w1, "b1": b1, "w2": w2, "b2": b2}, bucket_size_byte=4
    )

    out = ddp.forward(x)
    out = jax.block_until_ready(out)
    assert out.shape == (batch, out_features)
    assert out.dtype == jnp.float32

    # Tight check against a reference with matching bf16-operand numerics.
    ref_bf16 = mlp_forward_ref_bf16(x, w1, b1, w2, b2)
    assert jnp.allclose(out, ref_bf16, atol=1e-2, rtol=1e-2), \
        "mismatch vs bf16-operand reference"

    # Coarse sanity check against the pure-f32 module semantics.
    ref_f32 = mlp_forward_ref_f32(x, w1, b1, w2, b2)
    assert jnp.allclose(out, ref_f32, atol=1e-1, rtol=1e-1), \
        "mismatch vs f32 reference"

    print("KERNEL_OK")
</pallas_src>

<mosaic_0001>
module attributes {stable_mosaic.version = 11 : i64} {
  func.func @_mlp_kernel(%arg0: i32, %arg1: memref<256x128xf32, #tpu.memory_space<vmem>>, %arg2: memref<128x256xbf16, #tpu.memory_space<vmem>>, %arg3: memref<1x256xf32, #tpu.memory_space<vmem>>, %arg4: memref<256x128xbf16, #tpu.memory_space<vmem>>, %arg5: memref<1x128xf32, #tpu.memory_space<vmem>>, %arg6: memref<256x128xf32, #tpu.memory_space<vmem>>) attributes {dimension_semantics = [#tpu.dimension_semantics<parallel>], iteration_bounds = array<i64: 4>, scalar_prefetch = 0 : i64, scratch_operands = 0 : i64, tpu.core_type = #tpu.core_type<tc>, window_params = [{transform_indices = @transform_0, window_bounds = array<i64: 256, 128>}, {pipeline_mode = #tpu.pipeline_mode<synchronous>, transform_indices = @transform_1, window_bounds = array<i64: 128, 256>}, {pipeline_mode = #tpu.pipeline_mode<synchronous>, transform_indices = @transform_2, window_bounds = array<i64: 1, 256>}, {pipeline_mode = #tpu.pipeline_mode<synchronous>, transform_indices = @transform_3, window_bounds = array<i64: 256, 128>}, {pipeline_mode = #tpu.pipeline_mode<synchronous>, transform_indices = @transform_4, window_bounds = array<i64: 1, 128>}, {transform_indices = @transform_5, window_bounds = array<i64: 256, 128>}]} {
    %c0 = arith.constant 0 : index
    %c0_0 = arith.constant 0 : index
    %0 = vector.load %arg1[%c0, %c0_0] : memref<256x128xf32, #tpu.memory_space<vmem>>, vector<256x128xf32>
    %1 = arith.truncf %0 : vector<256x128xf32> to vector<256x128xbf16>
    %c0_1 = arith.constant 0 : index
    %c0_2 = arith.constant 0 : index
    %2 = vector.load %arg2[%c0_1, %c0_2] : memref<128x256xbf16, #tpu.memory_space<vmem>>, vector<128x256xbf16>
    %cst = arith.constant dense<0.000000e+00> : vector<256x256xf32>
    %3 = tpu.matmul %1, %2, %cst {dimension_numbers = #tpu.dot_dimension_numbers<[1], [0], [0], [1], [0, 0, 1, 1], [], []>} : vector<256x128xbf16>, vector<128x256xbf16>, vector<256x256xf32> -> vector<256x256xf32>
    %c0_3 = arith.constant 0 : index
    %c0_4 = arith.constant 0 : index
    %4 = vector.load %arg3[%c0_3, %c0_4] : memref<1x256xf32, #tpu.memory_space<vmem>>, vector<1x256xf32>
    %5 = vector.broadcast %4 : vector<1x256xf32> to vector<256x256xf32>
    %6 = arith.addf %3, %5 : vector<256x256xf32>
    %cst_5 = arith.constant 0.000000e+00 : f32
    %7 = vector.broadcast %cst_5 : f32 to vector<256x256xf32>
    %8 = arith.maximumf %6, %7 : vector<256x256xf32>
    %9 = arith.truncf %8 : vector<256x256xf32> to vector<256x256xbf16>
    %c0_6 = arith.constant 0 : index
    %c0_7 = arith.constant 0 : index
    %10 = vector.load %arg4[%c0_6, %c0_7] : memref<256x128xbf16, #tpu.memory_space<vmem>>, vector<256x128xbf16>
    %cst_8 = arith.constant dense<0.000000e+00> : vector<256x128xf32>
    %11 = tpu.matmul %9, %10, %cst_8 {dimension_numbers = #tpu.dot_dimension_numbers<[1], [0], [0], [1], [0, 0, 1, 1], [], []>} : vector<256x256xbf16>, vector<256x128xbf16>, vector<256x128xf32> -> vector<256x128xf32>
    %c0_9 = arith.constant 0 : index
    %c0_10 = arith.constant 0 : index
    %12 = vector.load %arg5[%c0_9, %c0_10] : memref<1x128xf32, #tpu.memory_space<vmem>>, vector<1x128xf32>
    %13 = vector.broadcast %12 : vector<1x128xf32> to vector<256x128xf32>
    %14 = arith.addf %11, %13 : vector<256x128xf32>
    %c0_11 = arith.constant 0 : index
    %c0_12 = arith.constant 0 : index
    %15 = vector.load %arg6[%c0_11, %c0_12] : memref<256x128xf32, #tpu.memory_space<vmem>>, vector<256x128xf32>
    tpu.vector_store %arg6[%c0_11, %c0_12], %14 {strides = array<i32>} : memref<256x128xf32, #tpu.memory_space<vmem>>, vector<256x128xf32>,
    return
  }
  func.func @transform_0(%arg0: i32) -> (i32, i32) {
    %c0_i32 = arith.constant 0 : i32
    %c0_i32_0 = arith.constant 0 : i32
    return %arg0, %c0_i32 : i32, i32
  }
  func.func @transform_1(%arg0: i32) -> (i32, i32) {
    %c0_i32 = arith.constant 0 : i32
    %c0_i32_0 = arith.constant 0 : i32
    %c0_i32_1 = arith.constant 0 : i32
    return %c0_i32, %c0_i32_0 : i32, i32
  }
  func.func @transform_2(%arg0: i32) -> (i32, i32) {
    %c0_i32 = arith.constant 0 : i32
    %c0_i32_0 = arith.constant 0 : i32
    %c0_i32_1 = arith.constant 0 : i32
    return %c0_i32, %c0_i32_0 : i32, i32
  }
  func.func @transform_3(%arg0: i32) -> (i32, i32) {
    %c0_i32 = arith.constant 0 : i32
    %c0_i32_0 = arith.constant 0 : i32
    %c0_i32_1 = arith.constant 0 : i32
    return %c0_i32, %c0_i32_0 : i32, i32
  }
  func.func @transform_4(%arg0: i32) -> (i32, i32) {
    %c0_i32 = arith.constant 0 : i32
    %c0_i32_0 = arith.constant 0 : i32
    %c0_i32_1 = arith.constant 0 : i32
    return %c0_i32, %c0_i32_0 : i32, i32
  }
  func.func @transform_5(%arg0: i32) -> (i32, i32) {
    %c0_i32 = arith.constant 0 : i32
    %c0_i32_0 = arith.constant 0 : i32
    return %arg0, %c0_i32 : i32, i32
  }
}

module attributes {stable_mosaic.version = 11 : i64} {
  func.func @_mlp_kernel(%arg0: i32, %arg1: memref<256x128xf32, #tpu.memory_space<vmem>>, %arg2: memref<128x256xbf16, #tpu.memory_space<vmem>>, %arg3: memref<1x256xf32, #tpu.memory_space<vmem>>, %arg4: memref<256x128xbf16, #tpu.memory_space<vmem>>, %arg5: memref<1x128xf32, #tpu.memory_space<vmem>>, %arg6: memref<256x128xf32, #tpu.memory_space<vmem>>) attributes {dimension_semantics = [#tpu.dimension_semantics<parallel>], iteration_bounds = array<i64: 4>, scalar_prefetch = 0 : i64, scratch_operands = 0 : i64, tpu.core_type = #tpu.core_type<tc>, window_params = [{transform_indices = @transform_0, window_bounds = array<i64: 256, 128>}, {pipeline_mode = #tpu.pipeline_mode<synchronous>, transform_indices = @transform_1, window_bounds = array<i64: 128, 256>}, {pipeline_mode = #tpu.pipeline_mode<synchronous>, transform_indices = @transform_2, window_bounds = array<i64: 1, 256>}, {pipeline_mode = #tpu.pipeline_mode<synchronous>, transform_indices = @transform_3, window_bounds = array<i64: 256, 128>}, {pipeline_mode = #tpu.pipeline_mode<synchronous>, transform_indices = @transform_4, window_bounds = array<i64: 1, 128>}, {transform_indices = @transform_5, window_bounds = array<i64: 256, 128>}]} {
    %c0 = arith.constant 0 : index
    %c0_0 = arith.constant 0 : index
    %0 = vector.load %arg1[%c0, %c0_0] : memref<256x128xf32, #tpu.memory_space<vmem>>, vector<256x128xf32>
    %1 = arith.truncf %0 : vector<256x128xf32> to vector<256x128xbf16>
    %c0_1 = arith.constant 0 : index
    %c0_2 = arith.constant 0 : index
    %2 = vector.load %arg2[%c0_1, %c0_2] : memref<128x256xbf16, #tpu.memory_space<vmem>>, vector<128x256xbf16>
    %cst = arith.constant dense<0.000000e+00> : vector<256x256xf32>
    %3 = tpu.matmul %1, %2, %cst {dimension_numbers = #tpu.dot_dimension_numbers<[1], [0], [0], [1], [0, 0, 1, 1], [], []>} : vector<256x128xbf16>, vector<128x256xbf16>, vector<256x256xf32> -> vector<256x256xf32>
    %c0_3 = arith.constant 0 : index
    %c0_4 = arith.constant 0 : index
    %4 = vector.load %arg3[%c0_3, %c0_4] : memref<1x256xf32, #tpu.memory_space<vmem>>, vector<1x256xf32>
    %5 = vector.broadcast %4 : vector<1x256xf32> to vector<256x256xf32>
    %6 = arith.addf %3, %5 : vector<256x256xf32>
    %cst_5 = arith.constant 0.000000e+00 : f32
    %7 = vector.broadcast %cst_5 : f32 to vector<256x256xf32>
    %8 = arith.maximumf %6, %7 : vector<256x256xf32>
    %9 = arith.truncf %8 : vector<256x256xf32> to vector<256x256xbf16>
    %c0_6 = arith.constant 0 : index
    %c0_7 = arith.constant 0 : index
    %10 = vector.load %arg4[%c0_6, %c0_7] : memref<256x128xbf16, #tpu.memory_space<vmem>>, vector<256x128xbf16>
    %cst_8 = arith.constant dense<0.000000e+00> : vector<256x128xf32>
    %11 = tpu.matmul %9, %10, %cst_8 {dimension_numbers = #tpu.dot_dimension_numbers<[1], [0], [0], [1], [0, 0, 1, 1], [], []>} : vector<256x256xbf16>, vector<256x128xbf16>, vector<256x128xf32> -> vector<256x128xf32>
    %c0_9 = arith.constant 0 : index
    %c0_10 = arith.constant 0 : index
    %12 = vector.load %arg5[%c0_9, %c0_10] : memref<1x128xf32, #tpu.memory_space<vmem>>, vector<1x128xf32>
    %13 = vector.broadcast %12 : vector<1x128xf32> to vector<256x128xf32>
    %14 = arith.addf %11, %13 : vector<256x128xf32>
    %c0_11 = arith.constant 0 : index
    %c0_12 = arith.constant 0 : index
    %15 = vector.load %arg6[%c0_11, %c0_12] : memref<256x128xf32, #tpu.memory_space<vmem>>, vector<256x128xf32>
    tpu.vector_store %arg6[%c0_11, %c0_12], %14 {strides = array<i32>} : memref<256x128xf32, #tpu.memory_space<vmem>>, vector<256x128xf32>,
    return
  }
  func.func @transform_0(%arg0: i32) -> (i32, i32) {
    %c0_i32 = arith.constant 0 : i32
    %c0_i32_0 = arith.constant 0 : i32
    return %arg0, %c0_i32 : i32, i32
  }
  func.func @transform_1(%arg0: i32) -> (i32, i32) {
    %c0_i32 = arith.constant 0 : i32
    %c0_i32_0 = arith.constant 0 : i32
    %c0_i32_1 = arith.constant 0 : i32
    return %c0_i32, %c0_i32_0 : i32, i32
  }
  func.func @transform_2(%arg0: i32) -> (i32, i32) {
    %c0_i32 = arith.constant 0 : i32
    %c0_i32_0 = arith.constant 0 : i32
    %c0_i32_1 = arith.constant 0 : i32
    return %c0_i32, %c0_i32_0 : i32, i32
  }
  func.func @transform_3(%arg0: i32) -> (i32, i32) {
    %c0_i32 = arith.constant 0 : i32
    %c0_i32_0 = arith.constant 0 : i32
    %c0_i32_1 = arith.constant 0 : i32
    return %c0_i32, %c0_i32_0 : i32, i32
  }
  func.func @transform_4(%arg0: i32) -> (i32, i32) {
    %c0_i32 = arith.constant 0 : i32
    %c0_i32_0 = arith.constant 0 : i32
    %c0_i32_1 = arith.constant 0 : i32
    return %c0_i32, %c0_i32_0 : i32, i32
  }
  func.func @transform_5(%arg0: i32) -> (i32, i32) {
    %c0_i32 = arith.constant 0 : i32
    %c0_i32_0 = arith.constant 0 : i32
    return %arg0, %c0_i32 : i32, i32
  }
}

</mosaic_0001>

<bundles_post_ra>
// kernel: tpu_custom_call.1
= control target key start
LH: loop header
LB: loop body
LE: loop exit
PB: predicated region body
PF: predicated region fallthrough
CT: control target
= control target key end

     0   :  { %10 = vsyncpa [#allocation3], 0  ;;  %s2060_s0 = inlined_call_operand.hbm [shape: f32[1024,128], index: 0, kind: input, shape index: {}]   ;;  %s2061_s1 = inlined_call_operand.hbm [shape: bf16[128,256], index: 1, kind: input, shape index: {}]   ;;  %s2062_s2 = inlined_call_operand.vmem [shape: f32[1,256], index: 2, kind: input, shape index: {}]   ;;  %s2063_s3 = inlined_call_operand.hbm [shape: bf16[256,128], index: 3, kind: input, shape index: {}]   ;;  %s2064_s4 = inlined_call_operand.vmem [shape: f32[1,128], index: 4, kind: input, shape index: {}]   ;;  %s2065_s5 = inlined_call_operand.hbm [shape: f32[1024,128], index: 5, kind: output, shape index: {}]  }
   0x1   :  { %12 = vsyncpa [#allocation3 + $0x1], 0 }
   0x2   :  { %13 = vsyncpa [#allocation6], 0 }
   0x3   :  { %14 = vsyncpa [#allocation4], 0 }
   0x4   :  { %16 = vsyncpa [#allocation4 + $0x1], 0  ;;  %s1632_s18 = smov 0   ;;  %s1634_s19 = smov 0  }
   0x5   :  { %s1636_s20 = smov 0   ;;  %s1638_s21 = smov 0  }
   0x6 LB: > { %s1653_s22 = sadd.s32 4294967295, %s1589_s21   ;;  %s1154_s23 = sadd.s32 4294967294, %s1589_s21   ;;  %s1589_s21 = sphi %s1638_s21, %s2084_s21   ;;  %s1585_s20 = sphi %s1636_s20, %s2083_s20   ;;  %s1581_s19 = sphi %s1634_s19, %s2082_s19   ;;  %s1577_s18 = sphi %s1632_s18, %s2081_s18  }
   0x7   : > { %p42_p0 = scmp.ne.s32.totalorder %s1581_s19, %s1577_s18  ;;  %p2066_p1 = scmp.eq.s32.totalorder %s1653_s22, 0 }
   0x8   : > { %p156_p3 = scmp.eq.s32.totalorder %s1154_s23, 3  ;;  %p1155_p5 = scmp.ge.s32.totalorder %s1589_s21, 1 }
   0x9   : > { %p1662_p4 = por %p2066_p1, %p42_p0  ;;  %p163_p7 = scmp.lt.s32.totalorder %s1589_s21, 5 }
   0xa   : > { %p1667_p6 = por %p156_p3, %p42_p0  ;;  %s1591_s27 = smov [#allocation5]  }
   0xb   : > { %s2069_s24 = scalar_select %p1662_p4, 1, 0 }
   0xc   : > { %s2070_s25 = scalar_select %p1667_p6, 1, 0 }
   0xd   : > { %p1672_p8 = pnand %p1155_p5, %p163_p7  ;;  %s175_s28 = sshll.u32 %s1591_s27, 4  ;;  %s176_s28 = int_to_ptr.vmem [resolvable:$true] %s175_s28 }
   0xe   : > { %s1592_s30 = smov [#allocation7]   ;;  %s1433_s9 = scalar_lea.hbm %s2061_s1, 2048 }
   0xf   : > { %s2071_s26 = scalar_select %p1672_p8, 1, 0 }
  0x10   : > { %p1331_p9 = pneg %p1672_p8  ;;  %s191_s6 = sshll.u32 %s1592_s30, 4  ;;  %s1684_s6 = int_to_ptr.vmem [resolvable:$true] %s191_s6 }
  0x11   : > { %p1434_p11 = scmp.ne.s32.totalorder %s2061_s1, %s1433_s9  ;;  %p1440_p3 = scmp.lt.u32.totalorder %s1433_s9, %s2061_s1 }
  0x12   : > { %p1680_p10 = pnand %p1331_p9, %p2066_p1 }
  0x14   : > { %p1435_p12 = pneg %p1680_p10 }
  0x16   : > { %p1436_p13 = pnand %p1435_p12, %p1434_p11 }
  0x18   : > { %p1437_p0 = pneg %p1436_p13 }
  0x1a   : > { %p1442_p5 = pnand %p1440_p3, %p1437_p0 }
  0x1c   : > { %1445 = shalt.err (!%p1442_p5)
}
  0x1d   : > { %s1446_s14 = scalar_lea.vmem %s176_s28, 2048  ;;  %p1454_p2 = scmp.lt.s32.totalorder %s176_s28, %s176_s28 }
  0x1e   : > { %p1447_p7 = scmp.ne.s32.totalorder %s176_s28, %s1446_s14  ;;  %p1455_p6 = scmp.lt.s32.totalorder %s1446_s14, %s1446_s14 }
  0x20   : > { %p1449_p9 = pnand %p1447_p7, %p1435_p12  ;;  %p1456_p4 = por %p1455_p6, %p1454_p2 }
  0x22   : > { %p1450_p1 = pneg %p1449_p9 }
  0x24   : > { %p1457_p8 = pnand %p1456_p4, %p1450_p1 }
  0x26   : > { %1460 = shalt.err (!%p1457_p8)
}
  0x27   : > { %s1593_s15 = smov 128   ;;  %s1594_s16 = smov 8  }
  0x28   : > { %1334 = dma.hbm_to_vmem [thread:$0]  (!%p1680_p10), %s2061_s1, 2048, %s176_s28, [#allocation6], %s1593_s15, %s1593_s15, %s1594_s16  }
  0x29   : > { %s1461_s7 = scalar_lea.hbm %s2063_s3, 2048 }
  0x2a   : > { %p1462_p1 = scmp.ne.s32.totalorder %s2063_s3, %s1461_s7  ;;  %p1468_p6 = scmp.lt.u32.totalorder %s1461_s7, %s2063_s3 }
  0x2c   : > { %p1464_p2 = pnand %p1462_p1, %p1435_p12 }
  0x2e   : > { %p1465_p4 = pneg %p1464_p2 }
  0x30   : > { %p1470_p8 = pnand %p1468_p6, %p1465_p4 }
  0x32   : > { %1473 = shalt.err (!%p1470_p8)
}
  0x33   : > { %s1474_s28 = scalar_lea.vmem %s1684_s6, 2048  ;;  %p1482_p3 = scmp.lt.s32.totalorder %s1684_s6, %s1684_s6 }
  0x34   : > { %p1475_p11 = scmp.ne.s32.totalorder %s1684_s6, %s1474_s28  ;;  %p1483_p5 = scmp.lt.s32.totalorder %s1474_s28, %s1474_s28 }
  0x36   : > { %p1477_p13 = pnand %p1475_p11, %p1435_p12  ;;  %p1484_p7 = por %p1483_p5, %p1482_p3 }
  0x38   : > { %p1478_p0 = pneg %p1477_p13 }
  0x3a   : > { %p1485_p9 = pnand %p1484_p7, %p1478_p0 }
  0x3c   : > { %1488 = shalt.err (!%p1485_p9)
}
  0x3d   : > { %s1595_s12 = smov 64   ;;  %s1596_s13 = smov 4  }
  0x3e   : > { %1337 = dma.hbm_to_vmem [thread:$0]  (!%p1680_p10), %s2063_s3, 2048, %s1684_s6, [#allocation6], %s1595_s12, %s1595_s12, %s1596_s13  }
  0x3f   : > { %s1737_s23 = sadd.s32 1, %s1589_s21   ;;  %s29_s30 = sadd.s32 1, %s1585_s20 }
  0x40   : > { %s26_s27 = ssub.s32 %s1589_s21, %s1737_s23  ;;  %p36_p1 = scmp.ne.s32.totalorder %s1585_s20, %s1581_s19 }
  0x41   : > { %p27_p12 = scmp.eq.s32.totalorder %s26_s27, 0  ;;  %p37_p2 = scmp.eq.s32.totalorder %s1589_s21, 0 }
  0x42   : > { %p2073_p6 = scmp.eq.s32.totalorder %s1653_s22, 3  ;;  %p1348_p11 = scmp.lt.s32.totalorder %s1589_s21, 4 }
  0x43   : > { %s1746_s7 = scalar_select %p27_p12, %s1585_s20, %s29_s30  }
  0x44   : > { %p38_p4 = por %p37_p2, %p36_p1  ;;  %p1750_p8 = por %p2073_p6, %p36_p1 }
  0x45   : > { %s208_s29 = sand.u32 1, %s1585_s20   ;;  %s1205_s6 = sshll.u32 %s1589_s21, 12 }
  0x46   : > { %s1159_s9 = sshll.u32 %s208_s29, 8  ;;  %s1760_s28 = scalar_lea.hbm %s2060_s0, %s1205_s6 }
  0x47   : > { %s212_s12 = scalar_lea.vmem [#allocation2], %s1159_s9  ;;  %p1764_p10 = pnand %p1348_p11, %p38_p4 }
  0x48   : > { %s219_s13 = sshll.u32 %s212_s12, 4  ;;  %s1768_s17 = scalar_lea.sflag [#allocation3], %s208_s29  ;;  %s1762_s13 = int_to_ptr.vmem [resolvable:$true] %s219_s13 }
  0x49   : > { %s1489_s27 = scalar_lea.hbm %s1760_s28, 4096  ;;  %p1491_p0 = pneg %p1764_p10 }
  0x4a   : > { %p1490_p13 = scmp.ne.s32.totalorder %s1760_s28, %s1489_s27  ;;  %s1494_s6 = scalar_lea.hbm %s2060_s0, 16384 }
  0x4b   : > { %p1495_p7 = scmp.lt.u32.totalorder %s1760_s28, %s2060_s0  ;;  %p1496_p9 = scmp.lt.u32.totalorder %s1494_s6, %s1489_s27 }
  0x4c   : > { %p1492_p3 = pnand %p1491_p0, %p1490_p13  ;;  %p1498_p1 = scmp.lt.u32.totalorder %s1489_s27, %s1760_s28 }
  0x4d   : > { %p1497_p12 = por %p1496_p9, %p1495_p7 }
  0x4e   : > { %p1493_p5 = pneg %p1492_p3 }
  0x4f   : > { %p1499_p2 = por %p1498_p1, %p1497_p12 }
  0x51   : > { %p1500_p4 = pnand %p1499_p2, %p1493_p5 }
  0x53   : > { %1503 = shalt.err (!%p1500_p4)
}
  0x54   : > { %s1504_s29 = scalar_lea.vmem %s1762_s13, 4096  ;;  %s1597_s12 = smov [#allocation2]  }
  0x55   : > { %p1505_p6 = scmp.ne.s32.totalorder %s1762_s13, %s1504_s29  ;;  %s1509_s30 = sshll.u32 %s1597_s12, 4  ;;  %s1510_s30 = int_to_ptr.vmem [resolvable:$false] %s1509_s30 }
  0x56   : > { %s1511_s9 = scalar_lea.vmem %s1510_s30, 8192  ;;  %p1512_p3 = scmp.lt.s32.totalorder %s1762_s13, %s1510_s30 }
  0x57   : > { %p1507_p11 = pnand %p1505_p6, %p1491_p0  ;;  %p1513_p7 = scmp.lt.s32.totalorder %s1511_s9, %s1504_s29 }
  0x59   : > { %p1508_p13 = pneg %p1507_p11  ;;  %p1514_p9 = por %p1513_p7, %p1512_p3 }
  0x5b   : > { %p1515_p12 = pnand %p1514_p9, %p1508_p13 }
  0x5d   : > { %1518 = shalt.err (!%p1515_p12)
}
  0x5e   : > { %1341 = dma.hbm_to_vmem [thread:$0]  (!%p1764_p10), %s1760_s28, 4096, %s1762_s13, %s1768_s17, %s1593_s15, %s1593_s15, %s1594_s16  }
  0x5f   : > { %p2076_p0 = scmp.ne.s32.totalorder %s2071_s26, 0 }
  0x60   : > { %s1802_s27 = sand.u32 (!%p2076_p0), 1, %s1581_s19   ;;  %p2077_p5 = scmp.ne.s32.totalorder (!%p2076_p0), %s2069_s24, 0 }
  0x61   : > { %231 = sbr.rel (%p2076_p0) target bundleno = 717 (0x2cd), region = 40  ;;  %s1163_s6 = sshll.u32 (!%p2076_p0), %s1802_s27, 8 }
  0x62   : > { %s234_s10 = scalar_lea.sflag (!%p2076_p0), [#allocation3], %s1802_s27  ;;  %s1808_s14 = scalar_lea.vmem (!%p2076_p0), [#allocation2], %s1163_s6 }
  0x68   : > { %1564 = dma.done.wait (%p2077_p5), %s234_s10, 4096  }
  0x69   : > { %1566 = vsyncadd (%p2077_p5), %s234_s10, 4294963200  ;;  %p2078_p10 = scmp.eq.s32.totalorder %s1653_s22, 0 }
  0x6b   : > { %1568 = dma.done.wait (%p2078_p10), [#allocation6], 4096   ;;  %p2079_p1 = pmov %p2078_p10 }
  0x6c   : > { %v1598_v0 = vmov 0   ;;  %v1393_v1 = vld [vmem:[#allocation5 + $0x4] ss:$8 sps:$4 sm:$0xff]   ;;  %v1395_v2 = vld [vmem:[#allocation5] ss:$8 sps:$4 sm:$0xff]   ;;  %v1421_v24 = vld [vmem:[#allocation7 + $0x50] sm:$0xff]  }
  0x6d   : > { %1570 = vsyncadd (%p2079_p1), [#allocation6], 4294963200  ;;  %463 = vmatprep.mubr.bf16.mxu0 %v1598_v0  ;;  %431 = vmatprep.subr.bf16.mxu0 %v1393_v1  ;;  %v1396_v3 = vld [vmem:[#allocation5 + $0x14] ss:$8 sps:$4 sm:$0xff]   ;;  %v1398_v4 = vld [vmem:[#allocation5 + $0x10] ss:$8 sps:$4 sm:$0xff]  }
  0x6e   : > { %432 = vmatpush1.bf16.msra.mxu0 %v1395_v2  ;;  %v1399_v5 = vld [vmem:[#allocation5 + $0x24] ss:$8 sps:$4 sm:$0xff]   ;;  %v1401_v6 = vld [vmem:[#allocation5 + $0x20] ss:$8 sps:$4 sm:$0xff]   ;;  %v1402_v7 = vld [vmem:[#allocation5 + $0x34] ss:$8 sps:$4 sm:$0xff]  }
  0x6f   : > { %433 = vmatprep.subr.bf16.mxu0 %v1396_v3  ;;  %v1404_v8 = vld [vmem:[#allocation5 + $0x30] ss:$8 sps:$4 sm:$0xff]   ;;  %v1405_v9 = vld [vmem:[#allocation5 + $0x44] ss:$8 sps:$4 sm:$0xff]   ;;  %v1407_v10 = vld [vmem:[#allocation5 + $0x40] ss:$8 sps:$4 sm:$0xff]  }
  0x70   : > { %v1408_v11 = vld [vmem:[#allocation5 + $0x54] ss:$8 sps:$4 sm:$0xff]   ;;  %v1410_v12 = vld [vmem:[#allocation5 + $0x50] ss:$8 sps:$4 sm:$0xff]   ;;  %v1411_v13 = vld [vmem:[#allocation5 + $0x64] ss:$8 sps:$4 sm:$0xff]  }
  0x71   : > { %v1413_v14 = vld [vmem:[#allocation5 + $0x60] ss:$8 sps:$4 sm:$0xff]   ;;  %v1414_v15 = vld [vmem:[#allocation5 + $0x74] ss:$8 sps:$4 sm:$0xff]   ;;  %v1416_v19 = vld [vmem:[#allocation5 + $0x70] ss:$8 sps:$4 sm:$0xff]  }
  0x72   : > { %434 = vmatpush1.bf16.msra.mxu0 %v1398_v4  ;;  %v1417_v16 = vld [vmem:[#allocation7 + $0x40] sm:$0xff]   ;;  %v1419_v18 = vld [vmem:[#allocation7 + $0x48] sm:$0xff]   ;;  %v1422_v25 = vld [vmem:[#allocation7 + $0x10] sm:$0xff]   ;;  %s1945_s28 = scalar_lea.vmem [#allocation8], %s1163_s6  ;;  %s1206_s13 = sshll.u32 %s1653_s22, 12 }
  0x73   : > { %435 = vmatprep.subr.bf16.mxu0 %v1399_v5  ;;  %v1418_v17 = vld [vmem:[#allocation7] sm:$0xff]   ;;  %v276_v21 = vld [vmem:[%s1808_s14 + $0x8] sm:$0xff]  ;;  %1207 = vmatprep.subr.bf16.mxu1 %v1417_v16  ;;  %v1423_v26 = vld [vmem:[#allocation7 + $0x58] sm:$0xff]   ;;  %s1062_s17 = sshll.u32 %s1945_s28, 4  ;;  %s2012_s12 = scalar_lea.hbm %s2065_s5, %s1206_s13  ;;  %s2014_s17 = int_to_ptr.vmem [resolvable:$true] %s1062_s17 }
  0x74   : > { %v275_v20 = vld [vmem:[%s1808_s14] sm:$0xff]  ;;  %1208 = vmatpush3.bf16.msra.mxu1 %v1418_v17  ;;  %v1420_v22 = vld [vmem:[#allocation7 + $0x8] sm:$0xff]   ;;  %v277_v27 = vld [vmem:[%s1808_s14 + $0x10] sm:$0xff]  ;;  %s1049_s22 = scalar_lea.sflag [#allocation4], %s1802_s27  ;;  %s1519_s30 = scalar_lea.vmem %s2014_s17, 4096 }
  0x75   : > { %v307_v23 = vpack.c.bf16 %v276_v21, %v275_v20  ;;  %1209 = vmatprep.subr.bf16.mxu1 %v1419_v18  ;;  %v278_v28 = vld [vmem:[%s1808_s14 + $0x18] sm:$0xff]  ;;  %v1425_v31 = vld [vmem:[#allocation7 + $0x60] sm:$0xff]   ;;  %v1427_v33 = vld [vmem:[#allocation7 + $0x68] sm:$0xff]   ;;  %v341_v18 = vlaneseq  ;;  %p1520_p2 = scmp.ne.s32.totalorder %s2014_s17, %s1519_s30  ;;  %s1599_s9 = smov [#allocation8]  }
  0x76   : > { %436 = vmatpush1.bf16.msra.mxu0 %v1401_v6  ;;  %v1424_v29 = vld [vmem:[#allocation7 + $0x18] sm:$0xff]   ;;  %v308_v30 = vpack.c.bf16 %v278_v28, %v277_v27  ;;  %v1426_v32 = vld [vmem:[#allocation7 + $0x20] sm:$0xff]   ;;  %v280_v35 = vld [vmem:[%s1808_s14 + $0x28] sm:$0xff]  ;;  %s1523_s6 = sshll.u32 %s1599_s9, 4  ;;  %s1524_s6 = int_to_ptr.vmem [resolvable:$false] %s1523_s6 }
  0x77   : > { %437 = vmatprep.subr.bf16.mxu0 %v1402_v7  ;;  %v279_v34 = vld [vmem:[%s1808_s14 + $0x20] sm:$0xff]  ;;  %v281_v37 = vld [vmem:[%s1808_s14 + $0x30] sm:$0xff]  ;;  %v282_v38 = vld [vmem:[%s1808_s14 + $0x38] sm:$0xff]  ;;  %p1521_p4 = pnand %p1520_p2, %p1750_p8  ;;  %s1525_s10 = scalar_lea.vmem %s1524_s6, 8192 }
  0x78   : > { %1210 = vmatpush3.bf16.msra.mxu1 %v1420_v22  ;;  %v309_v36 = vpack.c.bf16 %v280_v35, %v279_v34  ;;  %v310_v39 = vpack.c.bf16 %v282_v38, %v281_v37  ;;  %v283_v40 = vld [vmem:[%s1808_s14 + $0x40] sm:$0xff]  ;;  %v284_v41 = vld [vmem:[%s1808_s14 + $0x48] sm:$0xff]  ;;  %v285_v43 = vld [vmem:[%s1808_s14 + $0x50] sm:$0xff]  ;;  %p1526_p11 = scmp.lt.s32.totalorder %s2014_s17, %s1524_s6  ;;  %p1527_p13 = scmp.lt.s32.totalorder %s1525_s10, %s1519_s30 }
  0x79   : > { %1211 = vmatprep.subr.bf16.mxu1 %v1421_v24  ;;  %v311_v42 = vpack.c.bf16 %v284_v41, %v283_v40  ;;  %v286_v44 = vld [vmem:[%s1808_s14 + $0x58] sm:$0xff]  ;;  %v287_v46 = vld [vmem:[%s1808_s14 + $0x60] sm:$0xff]  ;;  %v288_v47 = vld [vmem:[%s1808_s14 + $0x68] sm:$0xff]  ;;  %p1522_p6 = pneg %p1521_p4 }
  0x7a   : > { %438 = vmatpush1.bf16.msra.mxu0 %v1404_v8  ;;  %v312_v45 = vpack.c.bf16 %v286_v44, %v285_v43  ;;  %v313_v48 = vpack.c.bf16 %v288_v47, %v287_v46  ;;  %v289_v49 = vld [vmem:[%s1808_s14 + $0x70] sm:$0xff]  ;;  %v290_v50 = vld [vmem:[%s1808_s14 + $0x78] sm:$0xff]  ;;  %v291_v52 = vld [vmem:[%s1808_s14 + $0x80] sm:$0xff]  ;;  %p1528_p3 = por %p1527_p13, %p1526_p11 }
  0x7b   : > { %439 = vmatprep.subr.bf16.mxu0 %v1405_v9  ;;  %v314_v51 = vpack.c.bf16 %v290_v50, %v289_v49  ;;  %v292_v53 = vld [vmem:[%s1808_s14 + $0x88] sm:$0xff]  ;;  %v293_v55 = vld [vmem:[%s1808_s14 + $0x90] sm:$0xff]  ;;  %v294_v56 = vld [vmem:[%s1808_s14 + $0x98] sm:$0xff] }
  0x7c   : > { %1212 = vmatpush3.bf16.msra.mxu1 %v1422_v25  ;;  %v315_v54 = vpack.c.bf16 %v292_v53, %v291_v52  ;;  %v316_v57 = vpack.c.bf16 %v294_v56, %v293_v55  ;;  %v295_v58 = vld [vmem:[%s1808_s14 + $0xa0] sm:$0xff]  ;;  %v296_v59 = vld [vmem:[%s1808_s14 + $0xa8] sm:$0xff]  ;;  %v297_v61 = vld [vmem:[%s1808_s14 + $0xb0] sm:$0xff]  ;;  %p1529_p7 = pnand %p1528_p3, %p1522_p6 }
  0x7d   : > { %1213 = vmatprep.subr.bf16.mxu1 %v1423_v26  ;;  %v317_v60 = vpack.c.bf16 %v296_v59, %v295_v58  ;;  %v298_v62 = vld [vmem:[%s1808_s14 + $0xb8] sm:$0xff]  ;;  %v1428_v63 = vld [vmem:[#allocation7 + $0x28] sm:$0xff]   ;;  %v1429_v2 = vld [vmem:[#allocation7 + $0x70] sm:$0xff]  }
  0x7e   : > { %440 = vmatpush1.bf16.msra.mxu0 %v1407_v10  ;;  %v318_v1 = vpack.c.bf16 %v298_v62, %v297_v61  ;;  %v1430_v3 = vld [vmem:[#allocation7 + $0x30] sm:$0xff]   ;;  %v1431_v4 = vld [vmem:[#allocation7 + $0x78] sm:$0xff]   ;;  %v299_v5 = vld [vmem:[%s1808_s14 + $0xc0] sm:$0xff] }
  0x7f   : > { %441 = vmatprep.subr.bf16.mxu0 %v1408_v11  ;;  %v300_v6 = vld [vmem:[%s1808_s14 + $0xc8] sm:$0xff]  ;;  %v1432_v7 = vld [vmem:[#allocation7 + $0x38] sm:$0xff]   ;;  %v301_v9 = vld [vmem:[%s1808_s14 + $0xd0] sm:$0xff] }
  0x80   : > { %1214 = vmatpush3.bf16.msra.mxu1 %v1424_v29  ;;  %v319_v8 = vpack.c.bf16 %v300_v6, %v299_v5  ;;  %v302_v10 = vld [vmem:[%s1808_s14 + $0xd8] sm:$0xff]  ;;  %v339_v21 = vld [vmem:[%s2062_s2] sm:$0x3] }
  0x81   : > { %1215 = vmatprep.subr.bf16.mxu1 %v1425_v31  ;;  %v320_v11 = vpack.c.bf16 %v302_v10, %v301_v9  ;;  %v306_v16 = vld [vmem:[%s1808_s14 + $0xf8] sm:$0xff] }
  0x82   : > { %442 = vmatpush1.bf16.msra.mxu0 %v1410_v12  ;;  %v303_v12 = vld [vmem:[%s1808_s14 + $0xe0] sm:$0xff] }
  0x83   : > { %443 = vmatprep.subr.bf16.mxu0 %v1411_v13  ;;  %v304_v13 = vld [vmem:[%s1808_s14 + $0xe8] sm:$0xff] }
  0x84   : > { %1216 = vmatpush3.bf16.msra.mxu1 %v1426_v32 }
  0x85   : > { %1217 = vmatprep.subr.bf16.mxu1 %v1427_v33 }
  0x86   : > { %444 = vmatpush1.bf16.msra.mxu0 %v1413_v14  ;;  %v321_v14 = vpack.c.bf16 %v304_v13, %v303_v12 }
  0x87   : > { %445 = vmatprep.subr.bf16.mxu0 %v1414_v15  ;;  %v305_v15 = vld [vmem:[%s1808_s14 + $0xf0] sm:$0xff] }
  0x88   : > { %1218 = vmatpush3.bf16.msra.mxu1 %v1428_v63  ;;  %v322_v17 = vpack.c.bf16 %v306_v16, %v305_v15 }
  0x89   : > { %1219 = vmatprep.subr.bf16.mxu1 %v1429_v2 }
  0x8a   : > { %446 = vmatpush1.bf16.msra.mxu0 %v1416_v19  ;;  %v342_v19 = vshrl.u32 %v341_v18, 7 }
  0x8c   : > { %1220 = vmatpush3.bf16.msra.mxu1 %v1430_v3  ;;  %v343_v20 = vsub.s32 0, %v342_v19  ;;  %v347_v22 = vsub.s32 1, %v342_v19 }
  0x8d   : > { %464 = vmatmul.mubr.bf16.vlgmr.msra.gmra.mrb[0].mxu0 %v307_v23  ;;  %1221 = vmatprep.subr.bf16.mxu1 %v1431_v4 }
  0x8e   : > { %473 = vmatprep.mubr.bf16.mxu0 %v1598_v0  ;;  %v1869_v23 = vrot.slane %v339_v21, %v343_v20  ;;  %v1871_v24 = vrot.slane %v339_v21, %v347_v22 }
  0x90   : > { %1222 = vmatpush3.bf16.msra.mxu1 %v1432_v7 }
  0x95   : > { %474 = vmatmul.mubr.bf16.gmra.mrb[4].mxu0 %v308_v30 }
  0x96   : > { %483 = vmatprep.mubr.bf16.mxu0 %v1598_v0 }
  0x9d   : > { %484 = vmatmul.mubr.bf16.gmra.mrb[8].mxu0 %v309_v36 }
  0x9e   : > { %493 = vmatprep.mubr.bf16.mxu0 %v1598_v0 }
  0xa5   : > { %494 = vmatmul.mubr.bf16.gmra.mrb[12].mxu0 %v310_v39 }
  0xa6   : > { %503 = vmatprep.mubr.bf16.mxu0 %v1598_v0 }
  0xad   : > { %504 = vmatmul.mubr.bf16.gmra.mrb[16].mxu0 %v311_v42 }
  0xae   : > { %513 = vmatprep.mubr.bf16.mxu0 %v1598_v0 }
  0xb5   : > { %514 = vmatmul.mubr.bf16.gmra.mrb[20].mxu0 %v312_v45 }
  0xb6   : > { %523 = vmatprep.mubr.bf16.mxu0 %v1598_v0 }
  0xbd   : > { %524 = vmatmul.mubr.bf16.gmra.mrb[24].mxu0 %v313_v48 }
  0xbe   : > { %533 = vmatprep.mubr.bf16.mxu0 %v1598_v0 }
  0xc5   : > { %534 = vmatmul.mubr.bf16.gmra.mrb[28].mxu0 %v314_v51 }
  0xc6   : > { %543 = vmatprep.mubr.bf16.mxu0 %v1598_v0 }
  0xcd   : > { %544 = vmatmul.mubr.bf16.gmra.mrb[32].mxu0 %v315_v54 }
  0xce   : > { %553 = vmatprep.mubr.bf16.mxu0 %v1598_v0 }
  0xd5   : > { %554 = vmatmul.mubr.bf16.gmra.mrb[36].mxu0 %v316_v57 }
  0xd6   : > { %563 = vmatprep.mubr.bf16.mxu0 %v1598_v0 }
  0xdd   : > { %564 = vmatmul.mubr.bf16.gmra.mrb[40].mxu0 %v317_v60 }
  0xde   : > { %573 = vmatprep.mubr.bf16.mxu0 %v1598_v0 }
  0xe5   : > { %574 = vmatmul.mubr.bf16.gmra.mrb[44].mxu0 %v318_v1 }
  0xe6   : > { %583 = vmatprep.mubr.bf16.mxu0 %v1598_v0 }
  0xed   : > { %584 = vmatmul.mubr.bf16.gmra.mrb[48].mxu0 %v319_v8 }
  0xee   : > { %593 = vmatprep.mubr.bf16.mxu0 %v1598_v0 }
  0xf5   : > { %594 = vmatmul.mubr.bf16.gmra.mrb[52].mxu0 %v320_v11 }
  0xf6   : > { %603 = vmatprep.mubr.bf16.mxu0 %v1598_v0 }
  0xfd   : > { %604 = vmatmul.mubr.bf16.gmra.mrb[56].mxu0 %v321_v14 }
  0xfe   : > { %613 = vmatprep.mubr.bf16.mxu0 %v1598_v0 }
 0x105   : > { %614 = vmatmul.mubr.bf16.gmra.mrb[60].mxu0 %v322_v17 }
 0x160   : > { %v465_v25 = vpop.f32.mrb[0].mxu0 }
 0x161   : > { %v466_v26 = vadd.f32 %v465_v25, %v1869_v23  ;;  %v467_v0 = vpop.f32.mrb[1].mxu0 }
 0x162   : > { %v468_v27 = vadd.f32 %v467_v0, %v1871_v24  ;;  %v469_v28 = vpop.f32.mrb[2].mxu0 }
 0x163   : > { %v470_v29 = vadd.f32 %v469_v28, %v1869_v23  ;;  %v471_v30 = vpop.f32.mrb[3].mxu0  ;;  %v624_v32 = vmax.f32 %v466_v26, 0.0 }
 0x164   : > { %v472_v31 = vadd.f32 %v471_v30, %v1871_v24  ;;  %v625_v34 = vmax.f32 %v468_v27, 0.0 }
 0x165   : > { %v626_v33 = vmax.f32 %v470_v29, 0.0 }
 0x166   : > { %v627_v35 = vmax.f32 %v472_v31, 0.0 }
 0x167   : > { %v688_v36 = vpack.c.bf16 %v626_v33, %v624_v32 }
 0x168   : > { %v475_v37 = vpop.f32.mrb[4].mxu0  ;;  %v689_v38 = vpack.c.bf16 %v627_v35, %v625_v34 }
 0x169   : > { %v476_v39 = vadd.f32 %v475_v37, %v1869_v23  ;;  %v477_v40 = vpop.f32.mrb[5].mxu0 }
 0x16a   : > { %v478_v41 = vadd.f32 %v477_v40, %v1871_v24  ;;  %v479_v42 = vpop.f32.mrb[6].mxu0  ;;  %887 = vmatprep.mubr.bf16.mxu1 %v689_v38 }
 0x16b   : > { %v480_v43 = vadd.f32 %v479_v42, %v1869_v23  ;;  %v481_v44 = vpop.f32.mrb[7].mxu0  ;;  %888 = vmatmul.mubr.bf16.vlgmr.msra.gmra.mrb[0].mxu1 %v688_v36  ;;  %v628_v46 = vmax.f32 %v476_v39, 0.0 }
 0x16c   : > { %v482_v45 = vadd.f32 %v481_v44, %v1871_v24  ;;  %v629_v48 = vmax.f32 %v478_v41, 0.0 }
 0x16d   : > { %v630_v47 = vmax.f32 %v480_v43, 0.0 }
 0x16e   : > { %v631_v49 = vmax.f32 %v482_v45, 0.0 }
 0x16f   : > { %v690_v50 = vpack.c.bf16 %v630_v47, %v628_v46 }
 0x170   : > { %v691_v51 = vpack.c.bf16 %v631_v49, %v629_v48  ;;  %v485_v52 = vpop.f32.mrb[8].mxu0 }
 0x171   : > { %v486_v53 = vadd.f32 %v485_v52, %v1869_v23  ;;  %v487_v54 = vpop.f32.mrb[9].mxu0 }
 0x172   : > { %v488_v55 = vadd.f32 %v487_v54, %v1871_v24  ;;  %v489_v56 = vpop.f32.mrb[10].mxu0  ;;  %895 = vmatprep.mubr.bf16.mxu1 %v691_v51 }
 0x173   : > { %v490_v57 = vadd.f32 %v489_v56, %v1869_v23  ;;  %v491_v58 = vpop.f32.mrb[11].mxu0  ;;  %896 = vmatmul.mubr.bf16.gmra.mrb[4].mxu1 %v690_v50  ;;  %v632_v60 = vmax.f32 %v486_v53, 0.0 }
 0x174   : > { %v492_v59 = vadd.f32 %v491_v58, %v1871_v24  ;;  %v633_v62 = vmax.f32 %v488_v55, 0.0 }
 0x175   : > { %v634_v61 = vmax.f32 %v490_v57, 0.0 }
 0x176   : > { %v635_v63 = vmax.f32 %v492_v59, 0.0 }
 0x177   : > { %v692_v1 = vpack.c.bf16 %v634_v61, %v632_v60 }
 0x178   : > { %v693_v2 = vpack.c.bf16 %v635_v63, %v633_v62  ;;  %v495_v3 = vpop.f32.mrb[12].mxu0 }
 0x179   : > { %v496_v4 = vadd.f32 %v495_v3, %v1869_v23  ;;  %v497_v5 = vpop.f32.mrb[13].mxu0 }
 0x17a   : > { %v498_v6 = vadd.f32 %v497_v5, %v1871_v24  ;;  %v499_v7 = vpop.f32.mrb[14].mxu0  ;;  %903 = vmatprep.mubr.bf16.mxu1 %v693_v2 }
 0x17b   : > { %v500_v8 = vadd.f32 %v499_v7, %v1869_v23  ;;  %v501_v9 = vpop.f32.mrb[15].mxu0  ;;  %904 = vmatmul.mubr.bf16.gmra.mrb[8].mxu1 %v692_v1  ;;  %v636_v11 = vmax.f32 %v496_v4, 0.0 }
 0x17c   : > { %v502_v10 = vadd.f32 %v501_v9, %v1871_v24  ;;  %v637_v13 = vmax.f32 %v498_v6, 0.0 }
 0x17d   : > { %v638_v12 = vmax.f32 %v500_v8, 0.0 }
 0x17e   : > { %v639_v14 = vmax.f32 %v502_v10, 0.0 }
 0x17f   : > { %v694_v15 = vpack.c.bf16 %v638_v12, %v636_v11 }
 0x180   : > { %v695_v16 = vpack.c.bf16 %v639_v14, %v637_v13  ;;  %v505_v17 = vpop.f32.mrb[16].mxu0 }
 0x181   : > { %v506_v18 = vadd.f32 %v505_v17, %v1869_v23  ;;  %v507_v19 = vpop.f32.mrb[17].mxu0 }
 0x182   : > { %v508_v20 = vadd.f32 %v507_v19, %v1871_v24  ;;  %v509_v21 = vpop.f32.mrb[18].mxu0  ;;  %911 = vmatprep.mubr.bf16.mxu1 %v695_v16 }
 0x183   : > { %v510_v22 = vadd.f32 %v509_v21, %v1869_v23  ;;  %v511_v25 = vpop.f32.mrb[19].mxu0  ;;  %912 = vmatmul.mubr.bf16.gmra.mrb[12].mxu1 %v694_v15  ;;  %v640_v0 = vmax.f32 %v506_v18, 0.0 }
 0x184   : > { %v512_v26 = vadd.f32 %v511_v25, %v1871_v24  ;;  %v641_v28 = vmax.f32 %v508_v20, 0.0 }
 0x185   : > { %v642_v27 = vmax.f32 %v510_v22, 0.0 }
 0x186   : > { %v643_v29 = vmax.f32 %v512_v26, 0.0 }
 0x187   : > { %v696_v30 = vpack.c.bf16 %v642_v27, %v640_v0 }
 0x188   : > { %v697_v31 = vpack.c.bf16 %v643_v29, %v641_v28  ;;  %v515_v32 = vpop.f32.mrb[20].mxu0 }
 0x189   : > { %v516_v33 = vadd.f32 %v515_v32, %v1869_v23  ;;  %v517_v34 = vpop.f32.mrb[21].mxu0 }
 0x18a   : > { %v518_v35 = vadd.f32 %v517_v34, %v1871_v24  ;;  %v519_v36 = vpop.f32.mrb[22].mxu0  ;;  %919 = vmatprep.mubr.bf16.mxu1 %v697_v31 }
 0x18b   : > { %v520_v37 = vadd.f32 %v519_v36, %v1869_v23  ;;  %v521_v38 = vpop.f32.mrb[23].mxu0  ;;  %920 = vmatmul.mubr.bf16.gmra.mrb[16].mxu1 %v696_v30  ;;  %v644_v40 = vmax.f32 %v516_v33, 0.0 }
 0x18c   : > { %v522_v39 = vadd.f32 %v521_v38, %v1871_v24  ;;  %v645_v42 = vmax.f32 %v518_v35, 0.0 }
 0x18d   : > { %v646_v41 = vmax.f32 %v520_v37, 0.0 }
 0x18e   : > { %v647_v43 = vmax.f32 %v522_v39, 0.0 }
 0x18f   : > { %v698_v44 = vpack.c.bf16 %v646_v41, %v644_v40 }
 0x190   : > { %v699_v45 = vpack.c.bf16 %v647_v43, %v645_v42  ;;  %v525_v46 = vpop.f32.mrb[24].mxu0 }
 0x191   : > { %v526_v47 = vadd.f32 %v525_v46, %v1869_v23  ;;  %v527_v48 = vpop.f32.mrb[25].mxu0 }
 0x192   : > { %v528_v49 = vadd.f32 %v527_v48, %v1871_v24  ;;  %v529_v50 = vpop.f32.mrb[26].mxu0  ;;  %927 = vmatprep.mubr.bf16.mxu1 %v699_v45 }
 0x193   : > { %v530_v51 = vadd.f32 %v529_v50, %v1869_v23  ;;  %v531_v52 = vpop.f32.mrb[27].mxu0  ;;  %928 = vmatmul.mubr.bf16.gmra.mrb[20].mxu1 %v698_v44  ;;  %v648_v54 = vmax.f32 %v526_v47, 0.0 }
 0x194   : > { %v532_v53 = vadd.f32 %v531_v52, %v1871_v24  ;;  %v649_v56 = vmax.f32 %v528_v49, 0.0 }
 0x195   : > { %v650_v55 = vmax.f32 %v530_v51, 0.0 }
 0x196   : > { %v651_v57 = vmax.f32 %v532_v53, 0.0 }
 0x197   : > { %v700_v58 = vpack.c.bf16 %v650_v55, %v648_v54 }
 0x198   : > { %v701_v59 = vpack.c.bf16 %v651_v57, %v649_v56  ;;  %v535_v60 = vpop.f32.mrb[28].mxu0 }
 0x199   : > { %v536_v61 = vadd.f32 %v535_v60, %v1869_v23  ;;  %v537_v62 = vpop.f32.mrb[29].mxu0 }
 0x19a   : > { %v538_v63 = vadd.f32 %v537_v62, %v1871_v24  ;;  %v539_v1 = vpop.f32.mrb[30].mxu0  ;;  %935 = vmatprep.mubr.bf16.mxu1 %v701_v59 }
 0x19b   : > { %v540_v2 = vadd.f32 %v539_v1, %v1869_v23  ;;  %v541_v3 = vpop.f32.mrb[31].mxu0  ;;  %936 = vmatmul.mubr.bf16.gmra.mrb[24].mxu1 %v700_v58  ;;  %v652_v5 = vmax.f32 %v536_v61, 0.0 }
 0x19c   : > { %v542_v4 = vadd.f32 %v541_v3, %v1871_v24  ;;  %v653_v7 = vmax.f32 %v538_v63, 0.0 }
 0x19d   : > { %v654_v6 = vmax.f32 %v540_v2, 0.0 }
 0x19e   : > { %v655_v8 = vmax.f32 %v542_v4, 0.0 }
 0x19f   : > { %v702_v9 = vpack.c.bf16 %v654_v6, %v652_v5 }
 0x1a0   : > { %v703_v10 = vpack.c.bf16 %v655_v8, %v653_v7  ;;  %v545_v11 = vpop.f32.mrb[32].mxu0 }
 0x1a1   : > { %v546_v12 = vadd.f32 %v545_v11, %v1869_v23  ;;  %v547_v13 = vpop.f32.mrb[33].mxu0 }
 0x1a2   : > { %v548_v14 = vadd.f32 %v547_v13, %v1871_v24  ;;  %v549_v15 = vpop.f32.mrb[34].mxu0  ;;  %943 = vmatprep.mubr.bf16.mxu1 %v703_v10 }
 0x1a3   : > { %v550_v16 = vadd.f32 %v549_v15, %v1869_v23  ;;  %v551_v17 = vpop.f32.mrb[35].mxu0  ;;  %944 = vmatmul.mubr.bf16.gmra.mrb[28].mxu1 %v702_v9  ;;  %v656_v19 = vmax.f32 %v546_v12, 0.0 }
 0x1a4   : > { %v552_v18 = vadd.f32 %v551_v17, %v1871_v24  ;;  %v657_v21 = vmax.f32 %v548_v14, 0.0 }
 0x1a5   : > { %v658_v20 = vmax.f32 %v550_v16, 0.0 }
 0x1a6   : > { %v659_v22 = vmax.f32 %v552_v18, 0.0 }
 0x1a7   : > { %v704_v25 = vpack.c.bf16 %v658_v20, %v656_v19 }
 0x1a8   : > { %v705_v26 = vpack.c.bf16 %v659_v22, %v657_v21  ;;  %v555_v0 = vpop.f32.mrb[36].mxu0 }
 0x1a9   : > { %v556_v27 = vadd.f32 %v555_v0, %v1869_v23  ;;  %v557_v28 = vpop.f32.mrb[37].mxu0 }
 0x1aa   : > { %v558_v29 = vadd.f32 %v557_v28, %v1871_v24  ;;  %v559_v30 = vpop.f32.mrb[38].mxu0  ;;  %951 = vmatprep.mubr.bf16.mxu1 %v705_v26 }
 0x1ab   : > { %v560_v31 = vadd.f32 %v559_v30, %v1869_v23  ;;  %v561_v32 = vpop.f32.mrb[39].mxu0  ;;  %952 = vmatmul.mubr.bf16.gmra.mrb[32].mxu1 %v704_v25  ;;  %v660_v34 = vmax.f32 %v556_v27, 0.0 }
 0x1ac   : > { %v562_v33 = vadd.f32 %v561_v32, %v1871_v24  ;;  %v661_v36 = vmax.f32 %v558_v29, 0.0 }
 0x1ad   : > { %v662_v35 = vmax.f32 %v560_v31, 0.0 }
 0x1ae   : > { %v663_v37 = vmax.f32 %v562_v33, 0.0 }
 0x1af   : > { %v706_v38 = vpack.c.bf16 %v662_v35, %v660_v34 }
 0x1b0   : > { %v707_v39 = vpack.c.bf16 %v663_v37, %v661_v36  ;;  %v565_v40 = vpop.f32.mrb[40].mxu0 }
 0x1b1   : > { %v566_v41 = vadd.f32 %v565_v40, %v1869_v23  ;;  %v567_v42 = vpop.f32.mrb[41].mxu0 }
 0x1b2   : > { %v568_v43 = vadd.f32 %v567_v42, %v1871_v24  ;;  %v569_v44 = vpop.f32.mrb[42].mxu0  ;;  %959 = vmatprep.mubr.bf16.mxu1 %v707_v39 }
 0x1b3   : > { %v570_v45 = vadd.f32 %v569_v44, %v1869_v23  ;;  %v571_v46 = vpop.f32.mrb[43].mxu0  ;;  %960 = vmatmul.mubr.bf16.gmra.mrb[36].mxu1 %v706_v38  ;;  %v664_v48 = vmax.f32 %v566_v41, 0.0 }
 0x1b4   : > { %v572_v47 = vadd.f32 %v571_v46, %v1871_v24  ;;  %v665_v50 = vmax.f32 %v568_v43, 0.0 }
 0x1b5   : > { %v666_v49 = vmax.f32 %v570_v45, 0.0 }
 0x1b6   : > { %v667_v51 = vmax.f32 %v572_v47, 0.0 }
 0x1b7   : > { %v708_v52 = vpack.c.bf16 %v666_v49, %v664_v48 }
 0x1b8   : > { %v709_v53 = vpack.c.bf16 %v667_v51, %v665_v50  ;;  %v575_v54 = vpop.f32.mrb[44].mxu0 }
 0x1b9   : > { %v576_v55 = vadd.f32 %v575_v54, %v1869_v23  ;;  %v577_v56 = vpop.f32.mrb[45].mxu0 }
 0x1ba   : > { %v578_v57 = vadd.f32 %v577_v56, %v1871_v24  ;;  %v579_v58 = vpop.f32.mrb[46].mxu0  ;;  %967 = vmatprep.mubr.bf16.mxu1 %v709_v53 }
 0x1bb   : > { %v580_v59 = vadd.f32 %v579_v58, %v1869_v23  ;;  %v581_v60 = vpop.f32.mrb[47].mxu0  ;;  %968 = vmatmul.mubr.bf16.gmra.mrb[40].mxu1 %v708_v52  ;;  %v668_v62 = vmax.f32 %v576_v55, 0.0 }
 0x1bc   : > { %v582_v61 = vadd.f32 %v581_v60, %v1871_v24  ;;  %v669_v1 = vmax.f32 %v578_v57, 0.0 }
 0x1bd   : > { %v670_v63 = vmax.f32 %v580_v59, 0.0 }
 0x1be   : > { %v671_v2 = vmax.f32 %v582_v61, 0.0 }
 0x1bf   : > { %v710_v3 = vpack.c.bf16 %v670_v63, %v668_v62  ;;  %v1940_v63 = vld [vmem:[%s2064_s4] ss:$0 sm:$0xff] }
 0x1c0   : > { %v711_v4 = vpack.c.bf16 %v671_v2, %v669_v1  ;;  %v585_v5 = vpop.f32.mrb[48].mxu0 }
 0x1c1   : > { %v586_v6 = vadd.f32 %v585_v5, %v1869_v23  ;;  %v587_v7 = vpop.f32.mrb[49].mxu0 }
 0x1c2   : > { %v588_v8 = vadd.f32 %v587_v7, %v1871_v24  ;;  %v589_v9 = vpop.f32.mrb[50].mxu0  ;;  %975 = vmatprep.mubr.bf16.mxu1 %v711_v4 }
 0x1c3   : > { %v590_v10 = vadd.f32 %v589_v9, %v1869_v23  ;;  %v591_v11 = vpop.f32.mrb[51].mxu0  ;;  %976 = vmatmul.mubr.bf16.gmra.mrb[44].mxu1 %v710_v3  ;;  %v672_v13 = vmax.f32 %v586_v6, 0.0 }
 0x1c4   : > { %v592_v12 = vadd.f32 %v591_v11, %v1871_v24  ;;  %v673_v15 = vmax.f32 %v588_v8, 0.0 }
 0x1c5   : > { %v674_v14 = vmax.f32 %v590_v10, 0.0 }
 0x1c6   : > { %v675_v16 = vmax.f32 %v592_v12, 0.0 }
 0x1c7   : > { %v712_v17 = vpack.c.bf16 %v674_v14, %v672_v13 }
 0x1c8   : > { %v713_v18 = vpack.c.bf16 %v675_v16, %v673_v15  ;;  %v595_v19 = vpop.f32.mrb[52].mxu0 }
 0x1c9   : > { %v596_v20 = vadd.f32 %v595_v19, %v1869_v23  ;;  %v597_v21 = vpop.f32.mrb[53].mxu0 }
 0x1ca   : > { %v598_v22 = vadd.f32 %v597_v21, %v1871_v24  ;;  %v599_v25 = vpop.f32.mrb[54].mxu0  ;;  %983 = vmatprep.mubr.bf16.mxu1 %v713_v18 }
 0x1cb   : > { %v600_v26 = vadd.f32 %v599_v25, %v1869_v23  ;;  %v601_v0 = vpop.f32.mrb[55].mxu0  ;;  %984 = vmatmul.mubr.bf16.gmra.mrb[48].mxu1 %v712_v17  ;;  %v676_v28 = vmax.f32 %v596_v20, 0.0 }
 0x1cc   : > { %v602_v27 = vadd.f32 %v601_v0, %v1871_v24  ;;  %v677_v30 = vmax.f32 %v598_v22, 0.0 }
 0x1cd   : > { %v678_v29 = vmax.f32 %v600_v26, 0.0 }
 0x1ce   : > { %v679_v31 = vmax.f32 %v602_v27, 0.0 }
 0x1cf   : > { %v714_v32 = vpack.c.bf16 %v678_v29, %v676_v28 }
 0x1d0   : > { %v715_v33 = vpack.c.bf16 %v679_v31, %v677_v30  ;;  %v605_v34 = vpop.f32.mrb[56].mxu0 }
 0x1d1   : > { %v606_v35 = vadd.f32 %v605_v34, %v1869_v23  ;;  %v607_v36 = vpop.f32.mrb[57].mxu0 }
 0x1d2   : > { %v608_v37 = vadd.f32 %v607_v36, %v1871_v24  ;;  %v609_v38 = vpop.f32.mrb[58].mxu0  ;;  %991 = vmatprep.mubr.bf16.mxu1 %v715_v33 }
 0x1d3   : > { %v610_v39 = vadd.f32 %v609_v38, %v1869_v23  ;;  %v611_v40 = vpop.f32.mrb[59].mxu0  ;;  %992 = vmatmul.mubr.bf16.gmra.mrb[52].mxu1 %v714_v32  ;;  %v680_v42 = vmax.f32 %v606_v35, 0.0 }
 0x1d4   : > { %v612_v41 = vadd.f32 %v611_v40, %v1871_v24  ;;  %v681_v44 = vmax.f32 %v608_v37, 0.0 }
 0x1d5   : > { %v682_v43 = vmax.f32 %v610_v39, 0.0 }
 0x1d6   : > { %v683_v45 = vmax.f32 %v612_v41, 0.0 }
 0x1d7   : > { %v716_v46 = vpack.c.bf16 %v682_v43, %v680_v42 }
 0x1d8   : > { %v717_v47 = vpack.c.bf16 %v683_v45, %v681_v44  ;;  %v615_v48 = vpop.f32.mrb[60].mxu0 }
 0x1d9   : > { %v616_v49 = vadd.f32 %v615_v48, %v1869_v23  ;;  %v617_v50 = vpop.f32.mrb[61].mxu0 }
 0x1da   : > { %v618_v51 = vadd.f32 %v617_v50, %v1871_v24  ;;  %v619_v52 = vpop.f32.mrb[62].mxu0  ;;  %999 = vmatprep.mubr.bf16.mxu1 %v717_v47 }
 0x1db   : > { %v620_v53 = vadd.f32 %v619_v52, %v1869_v23  ;;  %v621_v54 = vpop.f32.mrb[63].mxu0  ;;  %1000 = vmatmul.mubr.bf16.gmra.mrb[56].mxu1 %v716_v46  ;;  %v684_v56 = vmax.f32 %v616_v49, 0.0 }
 0x1dc   : > { %v622_v55 = vadd.f32 %v621_v54, %v1871_v24  ;;  %v685_v58 = vmax.f32 %v618_v51, 0.0 }
 0x1dd   : > { %v686_v57 = vmax.f32 %v620_v53, 0.0 }
 0x1de   : > { %v687_v59 = vmax.f32 %v622_v55, 0.0 }
 0x1df   : > { %v718_v60 = vpack.c.bf16 %v686_v57, %v684_v56 }
 0x1e0   : > { %v719_v61 = vpack.c.bf16 %v687_v59, %v685_v58 }
 0x1e2   : > { %1007 = vmatprep.mubr.bf16.mxu1 %v719_v61 }
 0x1e3   : > { %1008 = vmatmul.mubr.bf16.gmra.mrb[60].mxu1 %v718_v60 }
 0x23e   : > { %v1223_v62 = vpop.f32.mrb[0].mxu1 }
 0x23f   : > { %v1224_v23 = vpop.f32.mrb[1].mxu1 }
 0x240   : > { %v1225_v1 = vadd.f32 %v1224_v23, %v1223_v62  ;;  %v1226_v2 = vpop.f32.mrb[2].mxu1 }
 0x241   : > { %v1227_v3 = vpop.f32.mrb[3].mxu1 }
 0x242   : > { %v890_v24 = vadd.f32 %v1225_v1, %v1940_v63  ;;  %v1228_v4 = vadd.f32 %v1227_v3, %v1226_v2 }
 0x244   : > { %1016 = vst [vmem:[%s1945_s28] sm:$0xff] %v890_v24  ;;  %v893_v5 = vadd.f32 %v1228_v4, %v1940_v63 }
 0x246   : > { %1017 = vst [vmem:[%s1945_s28 + $0x8] sm:$0xff] %v893_v5  ;;  %v1229_v6 = vpop.f32.mrb[4].mxu1 }
 0x247   : > { %v1230_v7 = vpop.f32.mrb[5].mxu1 }
 0x248   : > { %v1231_v8 = vadd.f32 %v1230_v7, %v1229_v6  ;;  %v1232_v9 = vpop.f32.mrb[6].mxu1 }
 0x249   : > { %v1233_v10 = vpop.f32.mrb[7].mxu1 }
 0x24a   : > { %v898_v11 = vadd.f32 %v1231_v8, %v1940_v63  ;;  %v1234_v12 = vadd.f32 %v1233_v10, %v1232_v9 }
 0x24c   : > { %1018 = vst [vmem:[%s1945_s28 + $0x10] sm:$0xff] %v898_v11  ;;  %v901_v13 = vadd.f32 %v1234_v12, %v1940_v63 }
 0x24e   : > { %1019 = vst [vmem:[%s1945_s28 + $0x18] sm:$0xff] %v901_v13  ;;  %v1235_v14 = vpop.f32.mrb[8].mxu1 }
 0x24f   : > { %v1236_v15 = vpop.f32.mrb[9].mxu1 }
 0x250   : > { %v1237_v16 = vadd.f32 %v1236_v15, %v1235_v14  ;;  %v1238_v17 = vpop.f32.mrb[10].mxu1 }
 0x251   : > { %v1239_v18 = vpop.f32.mrb[11].mxu1 }
 0x252   : > { %v906_v19 = vadd.f32 %v1237_v16, %v1940_v63  ;;  %v1240_v20 = vadd.f32 %v1239_v18, %v1238_v17 }
 0x254   : > { %1020 = vst [vmem:[%s1945_s28 + $0x20] sm:$0xff] %v906_v19  ;;  %v909_v21 = vadd.f32 %v1240_v20, %v1940_v63 }
 0x256   : > { %1021 = vst [vmem:[%s1945_s28 + $0x28] sm:$0xff] %v909_v21  ;;  %v1241_v22 = vpop.f32.mrb[12].mxu1 }
 0x257   : > { %v1242_v25 = vpop.f32.mrb[13].mxu1 }
 0x258   : > { %v1243_v26 = vadd.f32 %v1242_v25, %v1241_v22  ;;  %v1244_v0 = vpop.f32.mrb[14].mxu1 }
 0x259   : > { %v1245_v27 = vpop.f32.mrb[15].mxu1 }
 0x25a   : > { %v914_v28 = vadd.f32 %v1243_v26, %v1940_v63  ;;  %v1246_v29 = vadd.f32 %v1245_v27, %v1244_v0 }
 0x25c   : > { %1022 = vst [vmem:[%s1945_s28 + $0x30] sm:$0xff] %v914_v28  ;;  %v917_v30 = vadd.f32 %v1246_v29, %v1940_v63 }
 0x25e   : > { %1023 = vst [vmem:[%s1945_s28 + $0x38] sm:$0xff] %v917_v30  ;;  %v1247_v31 = vpop.f32.mrb[16].mxu1 }
 0x25f   : > { %v1248_v32 = vpop.f32.mrb[17].mxu1 }
 0x260   : > { %v1249_v33 = vadd.f32 %v1248_v32, %v1247_v31  ;;  %v1250_v34 = vpop.f32.mrb[18].mxu1 }
 0x261   : > { %v1251_v35 = vpop.f32.mrb[19].mxu1 }
 0x262   : > { %v922_v36 = vadd.f32 %v1249_v33, %v1940_v63  ;;  %v1252_v37 = vadd.f32 %v1251_v35, %v1250_v34 }
 0x264   : > { %1024 = vst [vmem:[%s1945_s28 + $0x40] sm:$0xff] %v922_v36  ;;  %v925_v38 = vadd.f32 %v1252_v37, %v1940_v63 }
 0x266   : > { %1025 = vst [vmem:[%s1945_s28 + $0x48] sm:$0xff] %v925_v38  ;;  %v1253_v39 = vpop.f32.mrb[20].mxu1 }
 0x267   : > { %v1254_v40 = vpop.f32.mrb[21].mxu1 }
 0x268   : > { %v1255_v41 = vadd.f32 %v1254_v40, %v1253_v39  ;;  %v1256_v42 = vpop.f32.mrb[22].mxu1 }
 0x269   : > { %v1257_v43 = vpop.f32.mrb[23].mxu1 }
 0x26a   : > { %v930_v44 = vadd.f32 %v1255_v41, %v1940_v63  ;;  %v1258_v45 = vadd.f32 %v1257_v43, %v1256_v42 }
 0x26c   : > { %1026 = vst [vmem:[%s1945_s28 + $0x50] sm:$0xff] %v930_v44  ;;  %v933_v46 = vadd.f32 %v1258_v45, %v1940_v63 }
 0x26e   : > { %1027 = vst [vmem:[%s1945_s28 + $0x58] sm:$0xff] %v933_v46  ;;  %v1259_v47 = vpop.f32.mrb[24].mxu1 }
 0x26f   : > { %v1260_v48 = vpop.f32.mrb[25].mxu1 }
 0x270   : > { %v1261_v49 = vadd.f32 %v1260_v48, %v1259_v47  ;;  %v1262_v50 = vpop.f32.mrb[26].mxu1 }
 0x271   : > { %v1263_v51 = vpop.f32.mrb[27].mxu1 }
 0x272   : > { %v938_v52 = vadd.f32 %v1261_v49, %v1940_v63  ;;  %v1264_v53 = vadd.f32 %v1263_v51, %v1262_v50 }
 0x274   : > { %1028 = vst [vmem:[%s1945_s28 + $0x60] sm:$0xff] %v938_v52  ;;  %v941_v54 = vadd.f32 %v1264_v53, %v1940_v63 }
 0x276   : > { %1029 = vst [vmem:[%s1945_s28 + $0x68] sm:$0xff] %v941_v54  ;;  %v1265_v55 = vpop.f32.mrb[28].mxu1 }
 0x277   : > { %v1266_v56 = vpop.f32.mrb[29].mxu1 }
 0x278   : > { %v1267_v57 = vadd.f32 %v1266_v56, %v1265_v55  ;;  %v1268_v58 = vpop.f32.mrb[30].mxu1 }
 0x279   : > { %v1269_v59 = vpop.f32.mrb[31].mxu1 }
 0x27a   : > { %v946_v60 = vadd.f32 %v1267_v57, %v1940_v63  ;;  %v1270_v61 = vadd.f32 %v1269_v59, %v1268_v58 }
 0x27c   : > { %1030 = vst [vmem:[%s1945_s28 + $0x70] sm:$0xff] %v946_v60  ;;  %v949_v62 = vadd.f32 %v1270_v61, %v1940_v63 }
 0x27e   : > { %1031 = vst [vmem:[%s1945_s28 + $0x78] sm:$0xff] %v949_v62  ;;  %v1271_v23 = vpop.f32.mrb[32].mxu1 }
 0x27f   : > { %v1272_v1 = vpop.f32.mrb[33].mxu1 }
 0x280   : > { %v1273_v2 = vadd.f32 %v1272_v1, %v1271_v23  ;;  %v1274_v3 = vpop.f32.mrb[34].mxu1 }
 0x281   : > { %v1275_v24 = vpop.f32.mrb[35].mxu1 }
 0x282   : > { %v954_v4 = vadd.f32 %v1273_v2, %v1940_v63  ;;  %v1276_v5 = vadd.f32 %v1275_v24, %v1274_v3 }
 0x284   : > { %1032 = vst [vmem:[%s1945_s28 + $0x80] sm:$0xff] %v954_v4  ;;  %v957_v6 = vadd.f32 %v1276_v5, %v1940_v63 }
 0x286   : > { %1033 = vst [vmem:[%s1945_s28 + $0x88] sm:$0xff] %v957_v6  ;;  %v1277_v7 = vpop.f32.mrb[36].mxu1 }
 0x287   : > { %v1278_v8 = vpop.f32.mrb[37].mxu1 }
 0x288   : > { %v1279_v9 = vadd.f32 %v1278_v8, %v1277_v7  ;;  %v1280_v10 = vpop.f32.mrb[38].mxu1 }
 0x289   : > { %v1281_v11 = vpop.f32.mrb[39].mxu1 }
 0x28a   : > { %v962_v12 = vadd.f32 %v1279_v9, %v1940_v63  ;;  %v1282_v13 = vadd.f32 %v1281_v11, %v1280_v10 }
 0x28c   : > { %1034 = vst [vmem:[%s1945_s28 + $0x90] sm:$0xff] %v962_v12  ;;  %v965_v14 = vadd.f32 %v1282_v13, %v1940_v63 }
 0x28e   : > { %1035 = vst [vmem:[%s1945_s28 + $0x98] sm:$0xff] %v965_v14  ;;  %v1283_v15 = vpop.f32.mrb[40].mxu1 }
 0x28f   : > { %v1284_v16 = vpop.f32.mrb[41].mxu1 }
 0x290   : > { %v1285_v17 = vadd.f32 %v1284_v16, %v1283_v15  ;;  %v1286_v18 = vpop.f32.mrb[42].mxu1 }
 0x291   : > { %v1287_v19 = vpop.f32.mrb[43].mxu1 }
 0x292   : > { %v970_v20 = vadd.f32 %v1285_v17, %v1940_v63  ;;  %v1288_v21 = vadd.f32 %v1287_v19, %v1286_v18 }
 0x294   : > { %1036 = vst [vmem:[%s1945_s28 + $0xa0] sm:$0xff] %v970_v20  ;;  %v973_v22 = vadd.f32 %v1288_v21, %v1940_v63 }
 0x296   : > { %1037 = vst [vmem:[%s1945_s28 + $0xa8] sm:$0xff] %v973_v22  ;;  %v1289_v25 = vpop.f32.mrb[44].mxu1 }
 0x297   : > { %v1290_v26 = vpop.f32.mrb[45].mxu1 }
 0x298   : > { %v1291_v0 = vadd.f32 %v1290_v26, %v1289_v25  ;;  %v1292_v27 = vpop.f32.mrb[46].mxu1 }
 0x299   : > { %v1293_v28 = vpop.f32.mrb[47].mxu1 }
 0x29a   : > { %v978_v29 = vadd.f32 %v1291_v0, %v1940_v63  ;;  %v1294_v30 = vadd.f32 %v1293_v28, %v1292_v27 }
 0x29c   : > { %1038 = vst [vmem:[%s1945_s28 + $0xb0] sm:$0xff] %v978_v29  ;;  %v981_v31 = vadd.f32 %v1294_v30, %v1940_v63 }
 0x29e   : > { %1039 = vst [vmem:[%s1945_s28 + $0xb8] sm:$0xff] %v981_v31  ;;  %v1295_v32 = vpop.f32.mrb[48].mxu1 }
 0x29f   : > { %v1296_v33 = vpop.f32.mrb[49].mxu1 }
 0x2a0   : > { %v1297_v34 = vadd.f32 %v1296_v33, %v1295_v32  ;;  %v1298_v35 = vpop.f32.mrb[50].mxu1 }
 0x2a1   : > { %v1299_v36 = vpop.f32.mrb[51].mxu1 }
 0x2a2   : > { %v986_v37 = vadd.f32 %v1297_v34, %v1940_v63  ;;  %v1300_v38 = vadd.f32 %v1299_v36, %v1298_v35 }
 0x2a4   : > { %1040 = vst [vmem:[%s1945_s28 + $0xc0] sm:$0xff] %v986_v37  ;;  %v989_v39 = vadd.f32 %v1300_v38, %v1940_v63 }
 0x2a6   : > { %1041 = vst [vmem:[%s1945_s28 + $0xc8] sm:$0xff] %v989_v39  ;;  %v1301_v40 = vpop.f32.mrb[52].mxu1 }
 0x2a7   : > { %v1302_v41 = vpop.f32.mrb[53].mxu1 }
 0x2a8   : > { %v1303_v42 = vadd.f32 %v1302_v41, %v1301_v40  ;;  %v1304_v43 = vpop.f32.mrb[54].mxu1 }
 0x2a9   : > { %v1305_v44 = vpop.f32.mrb[55].mxu1 }
 0x2aa   : > { %v994_v45 = vadd.f32 %v1303_v42, %v1940_v63  ;;  %v1306_v46 = vadd.f32 %v1305_v44, %v1304_v43 }
 0x2ac   : > { %1042 = vst [vmem:[%s1945_s28 + $0xd0] sm:$0xff] %v994_v45  ;;  %v997_v47 = vadd.f32 %v1306_v46, %v1940_v63 }
 0x2ae   : > { %1043 = vst [vmem:[%s1945_s28 + $0xd8] sm:$0xff] %v997_v47  ;;  %v1307_v48 = vpop.f32.mrb[56].mxu1 }
 0x2af   : > { %v1308_v49 = vpop.f32.mrb[57].mxu1 }
 0x2b0   : > { %v1309_v50 = vadd.f32 %v1308_v49, %v1307_v48  ;;  %v1310_v51 = vpop.f32.mrb[58].mxu1 }
 0x2b1   : > { %v1311_v52 = vpop.f32.mrb[59].mxu1 }
 0x2b2   : > { %v1002_v53 = vadd.f32 %v1309_v50, %v1940_v63  ;;  %v1312_v54 = vadd.f32 %v1311_v52, %v1310_v51 }
 0x2b4   : > { %1044 = vst [vmem:[%s1945_s28 + $0xe0] sm:$0xff] %v1002_v53  ;;  %v1005_v55 = vadd.f32 %v1312_v54, %v1940_v63 }
 0x2b6   : > { %1045 = vst [vmem:[%s1945_s28 + $0xe8] sm:$0xff] %v1005_v55  ;;  %v1313_v56 = vpop.f32.mrb[60].mxu1 }
 0x2b7   : > { %v1314_v57 = vpop.f32.mrb[61].mxu1 }
 0x2b8   : > { %v1315_v58 = vadd.f32 %v1314_v57, %v1313_v56  ;;  %v1316_v59 = vpop.f32.mrb[62].mxu1 }
 0x2b9   : > { %v1317_v60 = vpop.f32.mrb[63].mxu1 }
 0x2ba   : > { %v1010_v61 = vadd.f32 %v1315_v58, %v1940_v63  ;;  %v1318_v62 = vadd.f32 %v1317_v60, %v1316_v59 }
 0x2bc   : > { %1046 = vst [vmem:[%s1945_s28 + $0xf0] sm:$0xff] %v1010_v61  ;;  %v1013_v23 = vadd.f32 %v1318_v62, %v1940_v63 }
 0x2be   : > { %1047 = vst [vmem:[%s1945_s28 + $0xf8] sm:$0xff] %v1013_v23 }
 0x2bf   : > { %1532 = shalt.err (!%p1529_p7)
}
 0x2c0   : > { %s1533_s14 = scalar_lea.hbm %s2012_s12, 4096  ;;  %s1537_s15 = scalar_lea.hbm %s2065_s5, 16384 }
 0x2c1   : > { %p1534_p9 = scmp.ne.s32.totalorder %s2012_s12, %s1533_s14  ;;  %p1538_p5 = scmp.lt.u32.totalorder %s2012_s12, %s2065_s5 }
 0x2c2   : > { %p1539_p10 = scmp.lt.u32.totalorder %s1537_s15, %s1533_s14  ;;  %p1541_p2 = scmp.lt.u32.totalorder %s1533_s14, %s2012_s12 }
 0x2c3   : > { %p1535_p12 = pnand %p1534_p9, %p1750_p8 }
 0x2c4   : > { %p1540_p1 = por %p1539_p10, %p1538_p5 }
 0x2c5   : > { %p1536_p0 = pneg %p1535_p12 }
 0x2c6   : > { %p1542_p4 = por %p1541_p2, %p1540_p1 }
 0x2c8   : > { %p1543_p6 = pnand %p1542_p4, %p1536_p0 }
 0x2ca   : > { %1546 = shalt.err (!%p1543_p6)
}
 0x2cb   : > { %s1600_s13 = smov 128   ;;  %s1601_s11 = smov 8  }
 0x2cc   : > { %1329 = dma.vmem_to_hbm [thread:$0]  (%p1750_p8), %s2014_s17, 4096, %s2012_s12, %s1049_s22, %s1600_s13, %s1600_s13, %s1601_s11  }
 0x2cd PF: > { %p1351_p11 = scmp.ge.s32.totalorder %s1589_s21, 2  ;;  %s1077_s29 = sand.u32 1, %s1577_s18  }
 0x2ce   : > { %p2080_p13 = scmp.ne.s32.totalorder %s2070_s25, 0  ;;  %s1078_s30 = scalar_lea.sflag [#allocation4], %s1077_s29 }
 0x2d0   : > { %p1343_p3 = pnand %p1351_p11, %p2080_p13 }
 0x2d2   : > { %1572 = dma.done.wait (!%p1343_p3), %s1078_s30, 4096  }
 0x2d3   : > { %1574 = vsyncadd (!%p1343_p3), %s1078_s30, 4294963200  ;;  %p19_p7 = scmp.ge.s32.totalorder %s1737_s23, 6   ;;  %s2081_s18 = smov %s1581_s19 }
 0x2d4   : > { %s2082_s19 = smov %s1585_s20  ;;  %s2083_s20 = smov %s1746_s7 }
 0x2d5   : > { %s2084_s21 = smov %s1737_s23  ;;  %21 = sbr.rel (!%p19_p7) target bundleno = 6 (0x6), region = 93 }
 0x2dc   :  { %1083 = vsyncpa [#allocation3], 1 }
 0x2dd   :  { %1085 = vsyncpa [#allocation3 + $0x1], 1 }
 0x2de   :  { %1086 = vsyncpa [#allocation6], 1 }
 0x2df   :  { %1087 = vsyncpa [#allocation4], 1 }
 0x2e0   :  { %1089 = vsyncpa [#allocation4 + $0x1], 1 }

// kernel: tpu_custom_call.1
= control target key start
LH: loop header
LB: loop body
LE: loop exit
PB: predicated region body
PF: predicated region fallthrough
CT: control target
= control target key end

     0   :  { %10 = vsyncpa [#allocation3], 0  ;;  %s2060_s0 = inlined_call_operand.hbm [shape: f32[1024,128], index: 0, kind: input, shape index: {}]   ;;  %s2061_s1 = inlined_call_operand.hbm [shape: bf16[128,256], index: 1, kind: input, shape index: {}]   ;;  %s2062_s2 = inlined_call_operand.vmem [shape: f32[1,256], index: 2, kind: input, shape index: {}]   ;;  %s2063_s3 = inlined_call_operand.hbm [shape: bf16[256,128], index: 3, kind: input, shape index: {}]   ;;  %s2064_s4 = inlined_call_operand.vmem [shape: f32[1,128], index: 4, kind: input, shape index: {}]   ;;  %s2065_s5 = inlined_call_operand.hbm [shape: f32[1024,128], index: 5, kind: output, shape index: {}]  }
   0x1   :  { %12 = vsyncpa [#allocation3 + $0x1], 0 }
   0x2   :  { %13 = vsyncpa [#allocation6], 0 }
   0x3   :  { %14 = vsyncpa [#allocation4], 0 }
   0x4   :  { %16 = vsyncpa [#allocation4 + $0x1], 0  ;;  %s1632_s18 = smov 0   ;;  %s1634_s19 = smov 0  }
   0x5   :  { %s1636_s20 = smov 0   ;;  %s1638_s21 = smov 0  }
   0x6 LB: > { %s1653_s22 = sadd.s32 4294967295, %s1589_s21   ;;  %s1154_s23 = sadd.s32 4294967294, %s1589_s21   ;;  %s1589_s21 = sphi %s1638_s21, %s2084_s21   ;;  %s1585_s20 = sphi %s1636_s20, %s2083_s20   ;;  %s1581_s19 = sphi %s1634_s19, %s2082_s19   ;;  %s1577_s18 = sphi %s1632_s18, %s2081_s18  }
   0x7   : > { %p42_p0 = scmp.ne.s32.totalorder %s1581_s19, %s1577_s18  ;;  %p2066_p1 = scmp.eq.s32.totalorder %s1653_s22, 0 }
   0x8   : > { %p156_p3 = scmp.eq.s32.totalorder %s1154_s23, 3  ;;  %p1155_p5 = scmp.ge.s32.totalorder %s1589_s21, 1 }
   0x9   : > { %p1662_p4 = por %p2066_p1, %p42_p0  ;;  %p163_p7 = scmp.lt.s32.totalorder %s1589_s21, 5 }
   0xa   : > { %p1667_p6 = por %p156_p3, %p42_p0  ;;  %s1591_s27 = smov [#allocation5]  }
   0xb   : > { %s2069_s24 = scalar_select %p1662_p4, 1, 0 }
   0xc   : > { %s2070_s25 = scalar_select %p1667_p6, 1, 0 }
   0xd   : > { %p1672_p8 = pnand %p1155_p5, %p163_p7  ;;  %s175_s28 = sshll.u32 %s1591_s27, 4  ;;  %s176_s28 = int_to_ptr.vmem [resolvable:$true] %s175_s28 }
   0xe   : > { %s1592_s30 = smov [#allocation7]   ;;  %s1433_s9 = scalar_lea.hbm %s2061_s1, 2048 }
   0xf   : > { %s2071_s26 = scalar_select %p1672_p8, 1, 0 }
  0x10   : > { %p1331_p9 = pneg %p1672_p8  ;;  %s191_s6 = sshll.u32 %s1592_s30, 4  ;;  %s1684_s6 = int_to_ptr.vmem [resolvable:$true] %s191_s6 }
  0x11   : > { %p1434_p11 = scmp.ne.s32.totalorder %s2061_s1, %s1433_s9  ;;  %p1440_p3 = scmp.lt.u32.totalorder %s1433_s9, %s2061_s1 }
  0x12   : > { %p1680_p10 = pnand %p1331_p9, %p2066_p1 }
  0x14   : > { %p1435_p12 = pneg %p1680_p10 }
  0x16   : > { %p1436_p13 = pnand %p1435_p12, %p1434_p11 }
  0x18   : > { %p1437_p0 = pneg %p1436_p13 }
  0x1a   : > { %p1442_p5 = pnand %p1440_p3, %p1437_p0 }
  0x1c   : > { %1445 = shalt.err (!%p1442_p5)
}
  0x1d   : > { %s1446_s14 = scalar_lea.vmem %s176_s28, 2048  ;;  %p1454_p2 = scmp.lt.s32.totalorder %s176_s28, %s176_s28 }
  0x1e   : > { %p1447_p7 = scmp.ne.s32.totalorder %s176_s28, %s1446_s14  ;;  %p1455_p6 = scmp.lt.s32.totalorder %s1446_s14, %s1446_s14 }
  0x20   : > { %p1449_p9 = pnand %p1447_p7, %p1435_p12  ;;  %p1456_p4 = por %p1455_p6, %p1454_p2 }
  0x22   : > { %p1450_p1 = pneg %p1449_p9 }
  0x24   : > { %p1457_p8 = pnand %p1456_p4, %p1450_p1 }
  0x26   : > { %1460 = shalt.err (!%p1457_p8)
}
  0x27   : > { %s1593_s15 = smov 128   ;;  %s1594_s16 = smov 8  }
  0x28   : > { %1334 = dma.hbm_to_vmem [thread:$0]  (!%p1680_p10), %s2061_s1, 2048, %s176_s28, [#allocation6], %s1593_s15, %s1593_s15, %s1594_s16  }
  0x29   : > { %s1461_s7 = scalar_lea.hbm %s2063_s3, 2048 }
  0x2a   : > { %p1462_p1 = scmp.ne.s32.totalorder %s2063_s3, %s1461_s7  ;;  %p1468_p6 = scmp.lt.u32.totalorder %s1461_s7, %s2063_s3 }
  0x2c   : > { %p1464_p2 = pnand %p1462_p1, %p1435_p12 }
  0x2e   : > { %p1465_p4 = pneg %p1464_p2 }
  0x30   : > { %p1470_p8 = pnand %p1468_p6, %p1465_p4 }
  0x32   : > { %1473 = shalt.err (!%p1470_p8)
}
  0x33   : > { %s1474_s28 = scalar_lea.vmem %s1684_s6, 2048  ;;  %p1482_p3 = scmp.lt.s32.totalorder %s1684_s6, %s1684_s6 }
  0x34   : > { %p1475_p11 = scmp.ne.s32.totalorder %s1684_s6, %s1474_s28  ;;  %p1483_p5 = scmp.lt.s32.totalorder %s1474_s28, %s1474_s28 }
  0x36   : > { %p1477_p13 = pnand %p1475_p11, %p1435_p12  ;;  %p1484_p7 = por %p1483_p5, %p1482_p3 }
  0x38   : > { %p1478_p0 = pneg %p1477_p13 }
  0x3a   : > { %p1485_p9 = pnand %p1484_p7, %p1478_p0 }
  0x3c   : > { %1488 = shalt.err (!%p1485_p9)
}
  0x3d   : > { %s1595_s12 = smov 64   ;;  %s1596_s13 = smov 4  }
  0x3e   : > { %1337 = dma.hbm_to_vmem [thread:$0]  (!%p1680_p10), %s2063_s3, 2048, %s1684_s6, [#allocation6], %s1595_s12, %s1595_s12, %s1596_s13  }
  0x3f   : > { %s1737_s23 = sadd.s32 1, %s1589_s21   ;;  %s29_s30 = sadd.s32 1, %s1585_s20 }
  0x40   : > { %s26_s27 = ssub.s32 %s1589_s21, %s1737_s23  ;;  %p36_p1 = scmp.ne.s32.totalorder %s1585_s20, %s1581_s19 }
  0x41   : > { %p27_p12 = scmp.eq.s32.totalorder %s26_s27, 0  ;;  %p37_p2 = scmp.eq.s32.totalorder %s1589_s21, 0 }
  0x42   : > { %p2073_p6 = scmp.eq.s32.totalorder %s1653_s22, 3  ;;  %p1348_p11 = scmp.lt.s32.totalorder %s1589_s21, 4 }
  0x43   : > { %s1746_s7 = scalar_select %p27_p12, %s1585_s20, %s29_s30  }
  0x44   : > { %p38_p4 = por %p37_p2, %p36_p1  ;;  %p1750_p8 = por %p2073_p6, %p36_p1 }
  0x45   : > { %s208_s29 = sand.u32 1, %s1585_s20   ;;  %s1205_s6 = sshll.u32 %s1589_s21, 12 }
  0x46   : > { %s1159_s9 = sshll.u32 %s208_s29, 8  ;;  %s1760_s28 = scalar_lea.hbm %s2060_s0, %s1205_s6 }
  0x47   : > { %s212_s12 = scalar_lea.vmem [#allocation2], %s1159_s9  ;;  %p1764_p10 = pnand %p1348_p11, %p38_p4 }
  0x48   : > { %s219_s13 = sshll.u32 %s212_s12, 4  ;;  %s1768_s17 = scalar_lea.sflag [#allocation3], %s208_s29  ;;  %s1762_s13 = int_to_ptr.vmem [resolvable:$true] %s219_s13 }
  0x49   : > { %s1489_s27 = scalar_lea.hbm %s1760_s28, 4096  ;;  %p1491_p0 = pneg %p1764_p10 }
  0x4a   : > { %p1490_p13 = scmp.ne.s32.totalorder %s1760_s28, %s1489_s27  ;;  %s1494_s6 = scalar_lea.hbm %s2060_s0, 16384 }
  0x4b   : > { %p1495_p7 = scmp.lt.u32.totalorder %s1760_s28, %s2060_s0  ;;  %p1496_p9 = scmp.lt.u32.totalorder %s1494_s6, %s1489_s27 }
  0x4c   : > { %p1492_p3 = pnand %p1491_p0, %p1490_p13  ;;  %p1498_p1 = scmp.lt.u32.totalorder %s1489_s27, %s1760_s28 }
  0x4d   : > { %p1497_p12 = por %p1496_p9, %p1495_p7 }
  0x4e   : > { %p1493_p5 = pneg %p1492_p3 }
  0x4f   : > { %p1499_p2 = por %p1498_p1, %p1497_p12 }
  0x51   : > { %p1500_p4 = pnand %p1499_p2, %p1493_p5 }
  0x53   : > { %1503 = shalt.err (!%p1500_p4)
}
  0x54   : > { %s1504_s29 = scalar_lea.vmem %s1762_s13, 4096  ;;  %s1597_s12 = smov [#allocation2]  }
  0x55   : > { %p1505_p6 = scmp.ne.s32.totalorder %s1762_s13, %s1504_s29  ;;  %s1509_s30 = sshll.u32 %s1597_s12, 4  ;;  %s1510_s30 = int_to_ptr.vmem [resolvable:$false] %s1509_s30 }
  0x56   : > { %s1511_s9 = scalar_lea.vmem %s1510_s30, 8192  ;;  %p1512_p3 = scmp.lt.s32.totalorder %s1762_s13, %s1510_s30 }
  0x57   : > { %p1507_p11 = pnand %p1505_p6, %p1491_p0  ;;  %p1513_p7 = scmp.lt.s32.totalorder %s1511_s9, %s1504_s29 }
  0x59   : > { %p1508_p13 = pneg %p1507_p11  ;;  %p1514_p9 = por %p1513_p7, %p1512_p3 }
  0x5b   : > { %p1515_p12 = pnand %p1514_p9, %p1508_p13 }
  0x5d   : > { %1518 = shalt.err (!%p1515_p12)
}
  0x5e   : > { %1341 = dma.hbm_to_vmem [thread:$0]  (!%p1764_p10), %s1760_s28, 4096, %s1762_s13, %s1768_s17, %s1593_s15, %s1593_s15, %s1594_s16  }
  0x5f   : > { %p2076_p0 = scmp.ne.s32.totalorder %s2071_s26, 0 }
  0x60   : > { %s1802_s27 = sand.u32 (!%p2076_p0), 1, %s1581_s19   ;;  %p2077_p5 = scmp.ne.s32.totalorder (!%p2076_p0), %s2069_s24, 0 }
  0x61   : > { %231 = sbr.rel (%p2076_p0) target bundleno = 717 (0x2cd), region = 40  ;;  %s1163_s6 = sshll.u32 (!%p2076_p0), %s1802_s27, 8 }
  0x62   : > { %s234_s10 = scalar_lea.sflag (!%p2076_p0), [#allocation3], %s1802_s27  ;;  %s1808_s14 = scalar_lea.vmem (!%p2076_p0), [#allocation2], %s1163_s6 }
  0x68   : > { %1564 = dma.done.wait (%p2077_p5), %s234_s10, 4096  }
  0x69   : > { %1566 = vsyncadd (%p2077_p5), %s234_s10, 4294963200  ;;  %p2078_p10 = scmp.eq.s32.totalorder %s1653_s22, 0 }
  0x6b   : > { %1568 = dma.done.wait (%p2078_p10), [#allocation6], 4096   ;;  %p2079_p1 = pmov %p2078_p10 }
  0x6c   : > { %v1598_v0 = vmov 0   ;;  %v1393_v1 = vld [vmem:[#allocation5 + $0x4] ss:$8 sps:$4 sm:$0xff]   ;;  %v1395_v2 = vld [vmem:[#allocation5] ss:$8 sps:$4 sm:$0xff]   ;;  %v1421_v24 = vld [vmem:[#allocation7 + $0x50] sm:$0xff]  }
  0x6d   : > { %1570 = vsyncadd (%p2079_p1), [#allocation6], 4294963200  ;;  %463 = vmatprep.mubr.bf16.mxu0 %v1598_v0  ;;  %431 = vmatprep.subr.bf16.mxu0 %v1393_v1  ;;  %v1396_v3 = vld [vmem:[#allocation5 + $0x14] ss:$8 sps:$4 sm:$0xff]   ;;  %v1398_v4 = vld [vmem:[#allocation5 + $0x10] ss:$8 sps:$4 sm:$0xff]  }
  0x6e   : > { %432 = vmatpush1.bf16.msra.mxu0 %v1395_v2  ;;  %v1399_v5 = vld [vmem:[#allocation5 + $0x24] ss:$8 sps:$4 sm:$0xff]   ;;  %v1401_v6 = vld [vmem:[#allocation5 + $0x20] ss:$8 sps:$4 sm:$0xff]   ;;  %v1402_v7 = vld [vmem:[#allocation5 + $0x34] ss:$8 sps:$4 sm:$0xff]  }
  0x6f   : > { %433 = vmatprep.subr.bf16.mxu0 %v1396_v3  ;;  %v1404_v8 = vld [vmem:[#allocation5 + $0x30] ss:$8 sps:$4 sm:$0xff]   ;;  %v1405_v9 = vld [vmem:[#allocation5 + $0x44] ss:$8 sps:$4 sm:$0xff]   ;;  %v1407_v10 = vld [vmem:[#allocation5 + $0x40] ss:$8 sps:$4 sm:$0xff]  }
  0x70   : > { %v1408_v11 = vld [vmem:[#allocation5 + $0x54] ss:$8 sps:$4 sm:$0xff]   ;;  %v1410_v12 = vld [vmem:[#allocation5 + $0x50] ss:$8 sps:$4 sm:$0xff]   ;;  %v1411_v13 = vld [vmem:[#allocation5 + $0x64] ss:$8 sps:$4 sm:$0xff]  }
  0x71   : > { %v1413_v14 = vld [vmem:[#allocation5 + $0x60] ss:$8 sps:$4 sm:$0xff]   ;;  %v1414_v15 = vld [vmem:[#allocation5 + $0x74] ss:$8 sps:$4 sm:$0xff]   ;;  %v1416_v19 = vld [vmem:[#allocation5 + $0x70] ss:$8 sps:$4 sm:$0xff]  }
  0x72   : > { %434 = vmatpush1.bf16.msra.mxu0 %v1398_v4  ;;  %v1417_v16 = vld [vmem:[#allocation7 + $0x40] sm:$0xff]   ;;  %v1419_v18 = vld [vmem:[#allocation7 + $0x48] sm:$0xff]   ;;  %v1422_v25 = vld [vmem:[#allocation7 + $0x10] sm:$0xff]   ;;  %s1945_s28 = scalar_lea.vmem [#allocation8], %s1163_s6  ;;  %s1206_s13 = sshll.u32 %s1653_s22, 12 }
  0x73   : > { %435 = vmatprep.subr.bf16.mxu0 %v1399_v5  ;;  %v1418_v17 = vld [vmem:[#allocation7] sm:$0xff]   ;;  %v276_v21 = vld [vmem:[%s1808_s14 + $0x8] sm:$0xff]  ;;  %1207 = vmatprep.subr.bf16.mxu1 %v1417_v16  ;;  %v1423_v26 = vld [vmem:[#allocation7 + $0x58] sm:$0xff]   ;;  %s1062_s17 = sshll.u32 %s1945_s28, 4  ;;  %s2012_s12 = scalar_lea.hbm %s2065_s5, %s1206_s13  ;;  %s2014_s17 = int_to_ptr.vmem [resolvable:$true] %s1062_s17 }
  0x74   : > { %v275_v20 = vld [vmem:[%s1808_s14] sm:$0xff]  ;;  %1208 = vmatpush3.bf16.msra.mxu1 %v1418_v17  ;;  %v1420_v22 = vld [vmem:[#allocation7 + $0x8] sm:$0xff]   ;;  %v277_v27 = vld [vmem:[%s1808_s14 + $0x10] sm:$0xff]  ;;  %s1049_s22 = scalar_lea.sflag [#allocation4], %s1802_s27  ;;  %s1519_s30 = scalar_lea.vmem %s2014_s17, 4096 }
  0x75   : > { %v307_v23 = vpack.c.bf16 %v276_v21, %v275_v20  ;;  %1209 = vmatprep.subr.bf16.mxu1 %v1419_v18  ;;  %v278_v28 = vld [vmem:[%s1808_s14 + $0x18] sm:$0xff]  ;;  %v1425_v31 = vld [vmem:[#allocation7 + $0x60] sm:$0xff]   ;;  %v1427_v33 = vld [vmem:[#allocation7 + $0x68] sm:$0xff]   ;;  %v341_v18 = vlaneseq  ;;  %p1520_p2 = scmp.ne.s32.totalorder %s2014_s17, %s1519_s30  ;;  %s1599_s9 = smov [#allocation8]  }
  0x76   : > { %436 = vmatpush1.bf16.msra.mxu0 %v1401_v6  ;;  %v1424_v29 = vld [vmem:[#allocation7 + $0x18] sm:$0xff]   ;;  %v308_v30 = vpack.c.bf16 %v278_v28, %v277_v27  ;;  %v1426_v32 = vld [vmem:[#allocation7 + $0x20] sm:$0xff]   ;;  %v280_v35 = vld [vmem:[%s1808_s14 + $0x28] sm:$0xff]  ;;  %s1523_s6 = sshll.u32 %s1599_s9, 4  ;;  %s1524_s6 = int_to_ptr.vmem [resolvable:$false] %s1523_s6 }
  0x77   : > { %437 = vmatprep.subr.bf16.mxu0 %v1402_v7  ;;  %v279_v34 = vld [vmem:[%s1808_s14 + $0x20] sm:$0xff]  ;;  %v281_v37 = vld [vmem:[%s1808_s14 + $0x30] sm:$0xff]  ;;  %v282_v38 = vld [vmem:[%s1808_s14 + $0x38] sm:$0xff]  ;;  %p1521_p4 = pnand %p1520_p2, %p1750_p8  ;;  %s1525_s10 = scalar_lea.vmem %s1524_s6, 8192 }
  0x78   : > { %1210 = vmatpush3.bf16.msra.mxu1 %v1420_v22  ;;  %v309_v36 = vpack.c.bf16 %v280_v35, %v279_v34  ;;  %v310_v39 = vpack.c.bf16 %v282_v38, %v281_v37  ;;  %v283_v40 = vld [vmem:[%s1808_s14 + $0x40] sm:$0xff]  ;;  %v284_v41 = vld [vmem:[%s1808_s14 + $0x48] sm:$0xff]  ;;  %v285_v43 = vld [vmem:[%s1808_s14 + $0x50] sm:$0xff]  ;;  %p1526_p11 = scmp.lt.s32.totalorder %s2014_s17, %s1524_s6  ;;  %p1527_p13 = scmp.lt.s32.totalorder %s1525_s10, %s1519_s30 }
  0x79   : > { %1211 = vmatprep.subr.bf16.mxu1 %v1421_v24  ;;  %v311_v42 = vpack.c.bf16 %v284_v41, %v283_v40  ;;  %v286_v44 = vld [vmem:[%s1808_s14 + $0x58] sm:$0xff]  ;;  %v287_v46 = vld [vmem:[%s1808_s14 + $0x60] sm:$0xff]  ;;  %v288_v47 = vld [vmem:[%s1808_s14 + $0x68] sm:$0xff]  ;;  %p1522_p6 = pneg %p1521_p4 }
  0x7a   : > { %438 = vmatpush1.bf16.msra.mxu0 %v1404_v8  ;;  %v312_v45 = vpack.c.bf16 %v286_v44, %v285_v43  ;;  %v313_v48 = vpack.c.bf16 %v288_v47, %v287_v46  ;;  %v289_v49 = vld [vmem:[%s1808_s14 + $0x70] sm:$0xff]  ;;  %v290_v50 = vld [vmem:[%s1808_s14 + $0x78] sm:$0xff]  ;;  %v291_v52 = vld [vmem:[%s1808_s14 + $0x80] sm:$0xff]  ;;  %p1528_p3 = por %p1527_p13, %p1526_p11 }
  0x7b   : > { %439 = vmatprep.subr.bf16.mxu0 %v1405_v9  ;;  %v314_v51 = vpack.c.bf16 %v290_v50, %v289_v49  ;;  %v292_v53 = vld [vmem:[%s1808_s14 + $0x88] sm:$0xff]  ;;  %v293_v55 = vld [vmem:[%s1808_s14 + $0x90] sm:$0xff]  ;;  %v294_v56 = vld [vmem:[%s1808_s14 + $0x98] sm:$0xff] }
  0x7c   : > { %1212 = vmatpush3.bf16.msra.mxu1 %v1422_v25  ;;  %v315_v54 = vpack.c.bf16 %v292_v53, %v291_v52  ;;  %v316_v57 = vpack.c.bf16 %v294_v56, %v293_v55  ;;  %v295_v58 = vld [vmem:[%s1808_s14 + $0xa0] sm:$0xff]  ;;  %v296_v59 = vld [vmem:[%s1808_s14 + $0xa8] sm:$0xff]  ;;  %v297_v61 = vld [vmem:[%s1808_s14 + $0xb0] sm:$0xff]  ;;  %p1529_p7 = pnand %p1528_p3, %p1522_p6 }
  0x7d   : > { %1213 = vmatprep.subr.bf16.mxu1 %v1423_v26  ;;  %v317_v60 = vpack.c.bf16 %v296_v59, %v295_v58  ;;  %v298_v62 = vld [vmem:[%s1808_s14 + $0xb8] sm:$0xff]  ;;  %v1428_v63 = vld [vmem:[#allocation7 + $0x28] sm:$0xff]   ;;  %v1429_v2 = vld [vmem:[#allocation7 + $0x70] sm:$0xff]  }
  0x7e   : > { %440 = vmatpush1.bf16.msra.mxu0 %v1407_v10  ;;  %v318_v1 = vpack.c.bf16 %v298_v62, %v297_v61  ;;  %v1430_v3 = vld [vmem:[#allocation7 + $0x30] sm:$0xff]   ;;  %v1431_v4 = vld [vmem:[#allocation7 + $0x78] sm:$0xff]   ;;  %v299_v5 = vld [vmem:[%s1808_s14 + $0xc0] sm:$0xff] }
  0x7f   : > { %441 = vmatprep.subr.bf16.mxu0 %v1408_v11  ;;  %v300_v6 = vld [vmem:[%s1808_s14 + $0xc8] sm:$0xff]  ;;  %v1432_v7 = vld [vmem:[#allocation7 + $0x38] sm:$0xff]   ;;  %v301_v9 = vld [vmem:[%s1808_s14 + $0xd0] sm:$0xff] }
  0x80   : > { %1214 = vmatpush3.bf16.msra.mxu1 %v1424_v29  ;;  %v319_v8 = vpack.c.bf16 %v300_v6, %v299_v5  ;;  %v302_v10 = vld [vmem:[%s1808_s14 + $0xd8] sm:$0xff]  ;;  %v339_v21 = vld [vmem:[%s2062_s2] sm:$0x3] }
  0x81   : > { %1215 = vmatprep.subr.bf16.mxu1 %v1425_v31  ;;  %v320_v11 = vpack.c.bf16 %v302_v10, %v301_v9  ;;  %v306_v16 = vld [vmem:[%s1808_s14 + $0xf8] sm:$0xff] }
  0x82   : > { %442 = vmatpush1.bf16.msra.mxu0 %v1410_v12  ;;  %v303_v12 = vld [vmem:[%s1808_s14 + $0xe0] sm:$0xff] }
  0x83   : > { %443 = vmatprep.subr.bf16.mxu0 %v1411_v13  ;;  %v304_v13 = vld [vmem:[%s1808_s14 + $0xe8] sm:$0xff] }
  0x84   : > { %1216 = vmatpush3.bf16.msra.mxu1 %v1426_v32 }
  0x85   : > { %1217 = vmatprep.subr.bf16.mxu1 %v1427_v33 }
  0x86   : > { %444 = vmatpush1.bf16.msra.mxu0 %v1413_v14  ;;  %v321_v14 = vpack.c.bf16 %v304_v13, %v303_v12 }
  0x87   : > { %445 = vmatprep.subr.bf16.mxu0 %v1414_v15  ;;  %v305_v15 = vld [vmem:[%s1808_s14 + $0xf0] sm:$0xff] }
  0x88   : > { %1218 = vmatpush3.bf16.msra.mxu1 %v1428_v63  ;;  %v322_v17 = vpack.c.bf16 %v306_v16, %v305_v15 }
  0x89   : > { %1219 = vmatprep.subr.bf16.mxu1 %v1429_v2 }
  0x8a   : > { %446 = vmatpush1.bf16.msra.mxu0 %v1416_v19  ;;  %v342_v19 = vshrl.u32 %v341_v18, 7 }
  0x8c   : > { %1220 = vmatpush3.bf16.msra.mxu1 %v1430_v3  ;;  %v343_v20 = vsub.s32 0, %v342_v19  ;;  %v347_v22 = vsub.s32 1, %v342_v19 }
  0x8d   : > { %464 = vmatmul.mubr.bf16.vlgmr.msra.gmra.mrb[0].mxu0 %v307_v23  ;;  %1221 = vmatprep.subr.bf16.mxu1 %v1431_v4 }
  0x8e   : > { %473 = vmatprep.mubr.bf16.mxu0 %v1598_v0  ;;  %v1869_v23 = vrot.slane %v339_v21, %v343_v20  ;;  %v1871_v24 = vrot.slane %v339_v21, %v347_v22 }
  0x90   : > { %1222 = vmatpush3.bf16.msra.mxu1 %v1432_v7 }
  0x95   : > { %474 = vmatmul.mubr.bf16.gmra.mrb[4].mxu0 %v308_v30 }
  0x96   : > { %483 = vmatprep.mubr.bf16.mxu0 %v1598_v0 }
  0x9d   : > { %484 = vmatmul.mubr.bf16.gmra.mrb[8].mxu0 %v309_v36 }
  0x9e   : > { %493 = vmatprep.mubr.bf16.mxu0 %v1598_v0 }
  0xa5   : > { %494 = vmatmul.mubr.bf16.gmra.mrb[12].mxu0 %v310_v39 }
  0xa6   : > { %503 = vmatprep.mubr.bf16.mxu0 %v1598_v0 }
  0xad   : > { %504 = vmatmul.mubr.bf16.gmra.mrb[16].mxu0 %v311_v42 }
  0xae   : > { %513 = vmatprep.mubr.bf16.mxu0 %v1598_v0 }
  0xb5   : > { %514 = vmatmul.mubr.bf16.gmra.mrb[20].mxu0 %v312_v45 }
  0xb6   : > { %523 = vmatprep.mubr.bf16.mxu0 %v1598_v0 }
  0xbd   : > { %524 = vmatmul.mubr.bf16.gmra.mrb[24].mxu0 %v313_v48 }
  0xbe   : > { %533 = vmatprep.mubr.bf16.mxu0 %v1598_v0 }
  0xc5   : > { %534 = vmatmul.mubr.bf16.gmra.mrb[28].mxu0 %v314_v51 }
  0xc6   : > { %543 = vmatprep.mubr.bf16.mxu0 %v1598_v0 }
  0xcd   : > { %544 = vmatmul.mubr.bf16.gmra.mrb[32].mxu0 %v315_v54 }
  0xce   : > { %553 = vmatprep.mubr.bf16.mxu0 %v1598_v0 }
  0xd5   : > { %554 = vmatmul.mubr.bf16.gmra.mrb[36].mxu0 %v316_v57 }
  0xd6   : > { %563 = vmatprep.mubr.bf16.mxu0 %v1598_v0 }
  0xdd   : > { %564 = vmatmul.mubr.bf16.gmra.mrb[40].mxu0 %v317_v60 }
  0xde   : > { %573 = vmatprep.mubr.bf16.mxu0 %v1598_v0 }
  0xe5   : > { %574 = vmatmul.mubr.bf16.gmra.mrb[44].mxu0 %v318_v1 }
  0xe6   : > { %583 = vmatprep.mubr.bf16.mxu0 %v1598_v0 }
  0xed   : > { %584 = vmatmul.mubr.bf16.gmra.mrb[48].mxu0 %v319_v8 }
  0xee   : > { %593 = vmatprep.mubr.bf16.mxu0 %v1598_v0 }
  0xf5   : > { %594 = vmatmul.mubr.bf16.gmra.mrb[52].mxu0 %v320_v11 }
  0xf6   : > { %603 = vmatprep.mubr.bf16.mxu0 %v1598_v0 }
  0xfd   : > { %604 = vmatmul.mubr.bf16.gmra.mrb[56].mxu0 %v321_v14 }
  0xfe   : > { %613 = vmatprep.mubr.bf16.mxu0 %v1598_v0 }
 0x105   : > { %614 = vmatmul.mubr.bf16.gmra.mrb[60].mxu0 %v322_v17 }
 0x160   : > { %v465_v25 = vpop.f32.mrb[0].mxu0 }
 0x161   : > { %v466_v26 = vadd.f32 %v465_v25, %v1869_v23  ;;  %v467_v0 = vpop.f32.mrb[1].mxu0 }
 0x162   : > { %v468_v27 = vadd.f32 %v467_v0, %v1871_v24  ;;  %v469_v28 = vpop.f32.mrb[2].mxu0 }
 0x163   : > { %v470_v29 = vadd.f32 %v469_v28, %v1869_v23  ;;  %v471_v30 = vpop.f32.mrb[3].mxu0  ;;  %v624_v32 = vmax.f32 %v466_v26, 0.0 }
 0x164   : > { %v472_v31 = vadd.f32 %v471_v30, %v1871_v24  ;;  %v625_v34 = vmax.f32 %v468_v27, 0.0 }
 0x165   : > { %v626_v33 = vmax.f32 %v470_v29, 0.0 }
 0x166   : > { %v627_v35 = vmax.f32 %v472_v31, 0.0 }
 0x167   : > { %v688_v36 = vpack.c.bf16 %v626_v33, %v624_v32 }
 0x168   : > { %v475_v37 = vpop.f32.mrb[4].mxu0  ;;  %v689_v38 = vpack.c.bf16 %v627_v35, %v625_v34 }
 0x169   : > { %v476_v39 = vadd.f32 %v475_v37, %v1869_v23  ;;  %v477_v40 = vpop.f32.mrb[5].mxu0 }
 0x16a   : > { %v478_v41 = vadd.f32 %v477_v40, %v1871_v24  ;;  %v479_v42 = vpop.f32.mrb[6].mxu0  ;;  %887 = vmatprep.mubr.bf16.mxu1 %v689_v38 }
 0x16b   : > { %v480_v43 = vadd.f32 %v479_v42, %v1869_v23  ;;  %v481_v44 = vpop.f32.mrb[7].mxu0  ;;  %888 = vmatmul.mubr.bf16.vlgmr.msra.gmra.mrb[0].mxu1 %v688_v36  ;;  %v628_v46 = vmax.f32 %v476_v39, 0.0 }
 0x16c   : > { %v482_v45 = vadd.f32 %v481_v44, %v1871_v24  ;;  %v629_v48 = vmax.f32 %v478_v41, 0.0 }
 0x16d   : > { %v630_v47 = vmax.f32 %v480_v43, 0.0 }
 0x16e   : > { %v631_v49 = vmax.f32 %v482_v45, 0.0 }
 0x16f   : > { %v690_v50 = vpack.c.bf16 %v630_v47, %v628_v46 }
 0x170   : > { %v691_v51 = vpack.c.bf16 %v631_v49, %v629_v48  ;;  %v485_v52 = vpop.f32.mrb[8].mxu0 }
 0x171   : > { %v486_v53 = vadd.f32 %v485_v52, %v1869_v23  ;;  %v487_v54 = vpop.f32.mrb[9].mxu0 }
 0x172   : > { %v488_v55 = vadd.f32 %v487_v54, %v1871_v24  ;;  %v489_v56 = vpop.f32.mrb[10].mxu0  ;;  %895 = vmatprep.mubr.bf16.mxu1 %v691_v51 }
 0x173   : > { %v490_v57 = vadd.f32 %v489_v56, %v1869_v23  ;;  %v491_v58 = vpop.f32.mrb[11].mxu0  ;;  %896 = vmatmul.mubr.bf16.gmra.mrb[4].mxu1 %v690_v50  ;;  %v632_v60 = vmax.f32 %v486_v53, 0.0 }
 0x174   : > { %v492_v59 = vadd.f32 %v491_v58, %v1871_v24  ;;  %v633_v62 = vmax.f32 %v488_v55, 0.0 }
 0x175   : > { %v634_v61 = vmax.f32 %v490_v57, 0.0 }
 0x176   : > { %v635_v63 = vmax.f32 %v492_v59, 0.0 }
 0x177   : > { %v692_v1 = vpack.c.bf16 %v634_v61, %v632_v60 }
 0x178   : > { %v693_v2 = vpack.c.bf16 %v635_v63, %v633_v62  ;;  %v495_v3 = vpop.f32.mrb[12].mxu0 }
 0x179   : > { %v496_v4 = vadd.f32 %v495_v3, %v1869_v23  ;;  %v497_v5 = vpop.f32.mrb[13].mxu0 }
 0x17a   : > { %v498_v6 = vadd.f32 %v497_v5, %v1871_v24  ;;  %v499_v7 = vpop.f32.mrb[14].mxu0  ;;  %903 = vmatprep.mubr.bf16.mxu1 %v693_v2 }
 0x17b   : > { %v500_v8 = vadd.f32 %v499_v7, %v1869_v23  ;;  %v501_v9 = vpop.f32.mrb[15].mxu0  ;;  %904 = vmatmul.mubr.bf16.gmra.mrb[8].mxu1 %v692_v1  ;;  %v636_v11 = vmax.f32 %v496_v4, 0.0 }
 0x17c   : > { %v502_v10 = vadd.f32 %v501_v9, %v1871_v24  ;;  %v637_v13 = vmax.f32 %v498_v6, 0.0 }
 0x17d   : > { %v638_v12 = vmax.f32 %v500_v8, 0.0 }
 0x17e   : > { %v639_v14 = vmax.f32 %v502_v10, 0.0 }
 0x17f   : > { %v694_v15 = vpack.c.bf16 %v638_v12, %v636_v11 }
 0x180   : > { %v695_v16 = vpack.c.bf16 %v639_v14, %v637_v13  ;;  %v505_v17 = vpop.f32.mrb[16].mxu0 }
 0x181   : > { %v506_v18 = vadd.f32 %v505_v17, %v1869_v23  ;;  %v507_v19 = vpop.f32.mrb[17].mxu0 }
 0x182   : > { %v508_v20 = vadd.f32 %v507_v19, %v1871_v24  ;;  %v509_v21 = vpop.f32.mrb[18].mxu0  ;;  %911 = vmatprep.mubr.bf16.mxu1 %v695_v16 }
 0x183   : > { %v510_v22 = vadd.f32 %v509_v21, %v1869_v23  ;;  %v511_v25 = vpop.f32.mrb[19].mxu0  ;;  %912 = vmatmul.mubr.bf16.gmra.mrb[12].mxu1 %v694_v15  ;;  %v640_v0 = vmax.f32 %v506_v18, 0.0 }
 0x184   : > { %v512_v26 = vadd.f32 %v511_v25, %v1871_v24  ;;  %v641_v28 = vmax.f32 %v508_v20, 0.0 }
 0x185   : > { %v642_v27 = vmax.f32 %v510_v22, 0.0 }
 0x186   : > { %v643_v29 = vmax.f32 %v512_v26, 0.0 }
 0x187   : > { %v696_v30 = vpack.c.bf16 %v642_v27, %v640_v0 }
 0x188   : > { %v697_v31 = vpack.c.bf16 %v643_v29, %v641_v28  ;;  %v515_v32 = vpop.f32.mrb[20].mxu0 }
 0x189   : > { %v516_v33 = vadd.f32 %v515_v32, %v1869_v23  ;;  %v517_v34 = vpop.f32.mrb[21].mxu0 }
 0x18a   : > { %v518_v35 = vadd.f32 %v517_v34, %v1871_v24  ;;  %v519_v36 = vpop.f32.mrb[22].mxu0  ;;  %919 = vmatprep.mubr.bf16.mxu1 %v697_v31 }
 0x18b   : > { %v520_v37 = vadd.f32 %v519_v36, %v1869_v23  ;;  %v521_v38 = vpop.f32.mrb[23].mxu0  ;;  %920 = vmatmul.mubr.bf16.gmra.mrb[16].mxu1 %v696_v30  ;;  %v644_v40 = vmax.f32 %v516_v33, 0.0 }
 0x18c   : > { %v522_v39 = vadd.f32 %v521_v38, %v1871_v24  ;;  %v645_v42 = vmax.f32 %v518_v35, 0.0 }
 0x18d   : > { %v646_v41 = vmax.f32 %v520_v37, 0.0 }
 0x18e   : > { %v647_v43 = vmax.f32 %v522_v39, 0.0 }
 0x18f   : > { %v698_v44 = vpack.c.bf16 %v646_v41, %v644_v40 }
 0x190   : > { %v699_v45 = vpack.c.bf16 %v647_v43, %v645_v42  ;;  %v525_v46 = vpop.f32.mrb[24].mxu0 }
 0x191   : > { %v526_v47 = vadd.f32 %v525_v46, %v1869_v23  ;;  %v527_v48 = vpop.f32.mrb[25].mxu0 }
 0x192   : > { %v528_v49 = vadd.f32 %v527_v48, %v1871_v24  ;;  %v529_v50 = vpop.f32.mrb[26].mxu0  ;;  %927 = vmatprep.mubr.bf16.mxu1 %v699_v45 }
 0x193   : > { %v530_v51 = vadd.f32 %v529_v50, %v1869_v23  ;;  %v531_v52 = vpop.f32.mrb[27].mxu0  ;;  %928 = vmatmul.mubr.bf16.gmra.mrb[20].mxu1 %v698_v44  ;;  %v648_v54 = vmax.f32 %v526_v47, 0.0 }
 0x194   : > { %v532_v53 = vadd.f32 %v531_v52, %v1871_v24  ;;  %v649_v56 = vmax.f32 %v528_v49, 0.0 }
 0x195   : > { %v650_v55 = vmax.f32 %v530_v51, 0.0 }
 0x196   : > { %v651_v57 = vmax.f32 %v532_v53, 0.0 }
 0x197   : > { %v700_v58 = vpack.c.bf16 %v650_v55, %v648_v54 }
 0x198   : > { %v701_v59 = vpack.c.bf16 %v651_v57, %v649_v56  ;;  %v535_v60 = vpop.f32.mrb[28].mxu0 }
 0x199   : > { %v536_v61 = vadd.f32 %v535_v60, %v1869_v23  ;;  %v537_v62 = vpop.f32.mrb[29].mxu0 }
 0x19a   : > { %v538_v63 = vadd.f32 %v537_v62, %v1871_v24  ;;  %v539_v1 = vpop.f32.mrb[30].mxu0  ;;  %935 = vmatprep.mubr.bf16.mxu1 %v701_v59 }
 0x19b   : > { %v540_v2 = vadd.f32 %v539_v1, %v1869_v23  ;;  %v541_v3 = vpop.f32.mrb[31].mxu0  ;;  %936 = vmatmul.mubr.bf16.gmra.mrb[24].mxu1 %v700_v58  ;;  %v652_v5 = vmax.f32 %v536_v61, 0.0 }
 0x19c   : > { %v542_v4 = vadd.f32 %v541_v3, %v1871_v24  ;;  %v653_v7 = vmax.f32 %v538_v63, 0.0 }
 0x19d   : > { %v654_v6 = vmax.f32 %v540_v2, 0.0 }
 0x19e   : > { %v655_v8 = vmax.f32 %v542_v4, 0.0 }
 0x19f   : > { %v702_v9 = vpack.c.bf16 %v654_v6, %v652_v5 }
 0x1a0   : > { %v703_v10 = vpack.c.bf16 %v655_v8, %v653_v7  ;;  %v545_v11 = vpop.f32.mrb[32].mxu0 }
 0x1a1   : > { %v546_v12 = vadd.f32 %v545_v11, %v1869_v23  ;;  %v547_v13 = vpop.f32.mrb[33].mxu0 }
 0x1a2   : > { %v548_v14 = vadd.f32 %v547_v13, %v1871_v24  ;;  %v549_v15 = vpop.f32.mrb[34].mxu0  ;;  %943 = vmatprep.mubr.bf16.mxu1 %v703_v10 }
 0x1a3   : > { %v550_v16 = vadd.f32 %v549_v15, %v1869_v23  ;;  %v551_v17 = vpop.f32.mrb[35].mxu0  ;;  %944 = vmatmul.mubr.bf16.gmra.mrb[28].mxu1 %v702_v9  ;;  %v656_v19 = vmax.f32 %v546_v12, 0.0 }
 0x1a4   : > { %v552_v18 = vadd.f32 %v551_v17, %v1871_v24  ;;  %v657_v21 = vmax.f32 %v548_v14, 0.0 }
 0x1a5   : > { %v658_v20 = vmax.f32 %v550_v16, 0.0 }
 0x1a6   : > { %v659_v22 = vmax.f32 %v552_v18, 0.0 }
 0x1a7   : > { %v704_v25 = vpack.c.bf16 %v658_v20, %v656_v19 }
 0x1a8   : > { %v705_v26 = vpack.c.bf16 %v659_v22, %v657_v21  ;;  %v555_v0 = vpop.f32.mrb[36].mxu0 }
 0x1a9   : > { %v556_v27 = vadd.f32 %v555_v0, %v1869_v23  ;;  %v557_v28 = vpop.f32.mrb[37].mxu0 }
 0x1aa   : > { %v558_v29 = vadd.f32 %v557_v28, %v1871_v24  ;;  %v559_v30 = vpop.f32.mrb[38].mxu0  ;;  %951 = vmatprep.mubr.bf16.mxu1 %v705_v26 }
 0x1ab   : > { %v560_v31 = vadd.f32 %v559_v30, %v1869_v23  ;;  %v561_v32 = vpop.f32.mrb[39].mxu0  ;;  %952 = vmatmul.mubr.bf16.gmra.mrb[32].mxu1 %v704_v25  ;;  %v660_v34 = vmax.f32 %v556_v27, 0.0 }
 0x1ac   : > { %v562_v33 = vadd.f32 %v561_v32, %v1871_v24  ;;  %v661_v36 = vmax.f32 %v558_v29, 0.0 }
 0x1ad   : > { %v662_v35 = vmax.f32 %v560_v31, 0.0 }
 0x1ae   : > { %v663_v37 = vmax.f32 %v562_v33, 0.0 }
 0x1af   : > { %v706_v38 = vpack.c.bf16 %v662_v35, %v660_v34 }
 0x1b0   : > { %v707_v39 = vpack.c.bf16 %v663_v37, %v661_v36  ;;  %v565_v40 = vpop.f32.mrb[40].mxu0 }
 0x1b1   : > { %v566_v41 = vadd.f32 %v565_v40, %v1869_v23  ;;  %v567_v42 = vpop.f32.mrb[41].mxu0 }
 0x1b2   : > { %v568_v43 = vadd.f32 %v567_v42, %v1871_v24  ;;  %v569_v44 = vpop.f32.mrb[42].mxu0  ;;  %959 = vmatprep.mubr.bf16.mxu1 %v707_v39 }
 0x1b3   : > { %v570_v45 = vadd.f32 %v569_v44, %v1869_v23  ;;  %v571_v46 = vpop.f32.mrb[43].mxu0  ;;  %960 = vmatmul.mubr.bf16.gmra.mrb[36].mxu1 %v706_v38  ;;  %v664_v48 = vmax.f32 %v566_v41, 0.0 }
 0x1b4   : > { %v572_v47 = vadd.f32 %v571_v46, %v1871_v24  ;;  %v665_v50 = vmax.f32 %v568_v43, 0.0 }
 0x1b5   : > { %v666_v49 = vmax.f32 %v570_v45, 0.0 }
 0x1b6   : > { %v667_v51 = vmax.f32 %v572_v47, 0.0 }
 0x1b7   : > { %v708_v52 = vpack.c.bf16 %v666_v49, %v664_v48 }
 0x1b8   : > { %v709_v53 = vpack.c.bf16 %v667_v51, %v665_v50  ;;  %v575_v54 = vpop.f32.mrb[44].mxu0 }
 0x1b9   : > { %v576_v55 = vadd.f32 %v575_v54, %v1869_v23  ;;  %v577_v56 = vpop.f32.mrb[45].mxu0 }
 0x1ba   : > { %v578_v57 = vadd.f32 %v577_v56, %v1871_v24  ;;  %v579_v58 = vpop.f32.mrb[46].mxu0  ;;  %967 = vmatprep.mubr.bf16.mxu1 %v709_v53 }
 0x1bb   : > { %v580_v59 = vadd.f32 %v579_v58, %v1869_v23  ;;  %v581_v60 = vpop.f32.mrb[47].mxu0  ;;  %968 = vmatmul.mubr.bf16.gmra.mrb[40].mxu1 %v708_v52  ;;  %v668_v62 = vmax.f32 %v576_v55, 0.0 }
 0x1bc   : > { %v582_v61 = vadd.f32 %v581_v60, %v1871_v24  ;;  %v669_v1 = vmax.f32 %v578_v57, 0.0 }
 0x1bd   : > { %v670_v63 = vmax.f32 %v580_v59, 0.0 }
 0x1be   : > { %v671_v2 = vmax.f32 %v582_v61, 0.0 }
 0x1bf   : > { %v710_v3 = vpack.c.bf16 %v670_v63, %v668_v62  ;;  %v1940_v63 = vld [vmem:[%s2064_s4] ss:$0 sm:$0xff] }
 0x1c0   : > { %v711_v4 = vpack.c.bf16 %v671_v2, %v669_v1  ;;  %v585_v5 = vpop.f32.mrb[48].mxu0 }
 0x1c1   : > { %v586_v6 = vadd.f32 %v585_v5, %v1869_v23  ;;  %v587_v7 = vpop.f32.mrb[49].mxu0 }
 0x1c2   : > { %v588_v8 = vadd.f32 %v587_v7, %v1871_v24  ;;  %v589_v9 = vpop.f32.mrb[50].mxu0  ;;  %975 = vmatprep.mubr.bf16.mxu1 %v711_v4 }
 0x1c3   : > { %v590_v10 = vadd.f32 %v589_v9, %v1869_v23  ;;  %v591_v11 = vpop.f32.mrb[51].mxu0  ;;  %976 = vmatmul.mubr.bf16.gmra.mrb[44].mxu1 %v710_v3  ;;  %v672_v13 = vmax.f32 %v586_v6, 0.0 }
 0x1c4   : > { %v592_v12 = vadd.f32 %v591_v11, %v1871_v24  ;;  %v673_v15 = vmax.f32 %v588_v8, 0.0 }
 0x1c5   : > { %v674_v14 = vmax.f32 %v590_v10, 0.0 }
 0x1c6   : > { %v675_v16 = vmax.f32 %v592_v12, 0.0 }
 0x1c7   : > { %v712_v17 = vpack.c.bf16 %v674_v14, %v672_v13 }
 0x1c8   : > { %v713_v18 = vpack.c.bf16 %v675_v16, %v673_v15  ;;  %v595_v19 = vpop.f32.mrb[52].mxu0 }
 0x1c9   : > { %v596_v20 = vadd.f32 %v595_v19, %v1869_v23  ;;  %v597_v21 = vpop.f32.mrb[53].mxu0 }
 0x1ca   : > { %v598_v22 = vadd.f32 %v597_v21, %v1871_v24  ;;  %v599_v25 = vpop.f32.mrb[54].mxu0  ;;  %983 = vmatprep.mubr.bf16.mxu1 %v713_v18 }
 0x1cb   : > { %v600_v26 = vadd.f32 %v599_v25, %v1869_v23  ;;  %v601_v0 = vpop.f32.mrb[55].mxu0  ;;  %984 = vmatmul.mubr.bf16.gmra.mrb[48].mxu1 %v712_v17  ;;  %v676_v28 = vmax.f32 %v596_v20, 0.0 }
 0x1cc   : > { %v602_v27 = vadd.f32 %v601_v0, %v1871_v24  ;;  %v677_v30 = vmax.f32 %v598_v22, 0.0 }
 0x1cd   : > { %v678_v29 = vmax.f32 %v600_v26, 0.0 }
 0x1ce   : > { %v679_v31 = vmax.f32 %v602_v27, 0.0 }
 0x1cf   : > { %v714_v32 = vpack.c.bf16 %v678_v29, %v676_v28 }
 0x1d0   : > { %v715_v33 = vpack.c.bf16 %v679_v31, %v677_v30  ;;  %v605_v34 = vpop.f32.mrb[56].mxu0 }
 0x1d1   : > { %v606_v35 = vadd.f32 %v605_v34, %v1869_v23  ;;  %v607_v36 = vpop.f32.mrb[57].mxu0 }
 0x1d2   : > { %v608_v37 = vadd.f32 %v607_v36, %v1871_v24  ;;  %v609_v38 = vpop.f32.mrb[58].mxu0  ;;  %991 = vmatprep.mubr.bf16.mxu1 %v715_v33 }
 0x1d3   : > { %v610_v39 = vadd.f32 %v609_v38, %v1869_v23  ;;  %v611_v40 = vpop.f32.mrb[59].mxu0  ;;  %992 = vmatmul.mubr.bf16.gmra.mrb[52].mxu1 %v714_v32  ;;  %v680_v42 = vmax.f32 %v606_v35, 0.0 }
 0x1d4   : > { %v612_v41 = vadd.f32 %v611_v40, %v1871_v24  ;;  %v681_v44 = vmax.f32 %v608_v37, 0.0 }
 0x1d5   : > { %v682_v43 = vmax.f32 %v610_v39, 0.0 }
 0x1d6   : > { %v683_v45 = vmax.f32 %v612_v41, 0.0 }
 0x1d7   : > { %v716_v46 = vpack.c.bf16 %v682_v43, %v680_v42 }
 0x1d8   : > { %v717_v47 = vpack.c.bf16 %v683_v45, %v681_v44  ;;  %v615_v48 = vpop.f32.mrb[60].mxu0 }
 0x1d9   : > { %v616_v49 = vadd.f32 %v615_v48, %v1869_v23  ;;  %v617_v50 = vpop.f32.mrb[61].mxu0 }
 0x1da   : > { %v618_v51 = vadd.f32 %v617_v50, %v1871_v24  ;;  %v619_v52 = vpop.f32.mrb[62].mxu0  ;;  %999 = vmatprep.mubr.bf16.mxu1 %v717_v47 }
 0x1db   : > { %v620_v53 = vadd.f32 %v619_v52, %v1869_v23  ;;  %v621_v54 = vpop.f32.mrb[63].mxu0  ;;  %1000 = vmatmul.mubr.bf16.gmra.mrb[56].mxu1 %v716_v46  ;;  %v684_v56 = vmax.f32 %v616_v49, 0.0 }
 0x1dc   : > { %v622_v55 = vadd.f32 %v621_v54, %v1871_v24  ;;  %v685_v58 = vmax.f32 %v618_v51, 0.0 }
 0x1dd   : > { %v686_v57 = vmax.f32 %v620_v53, 0.0 }
 0x1de   : > { %v687_v59 = vmax.f32 %v622_v55, 0.0 }
 0x1df   : > { %v718_v60 = vpack.c.bf16 %v686_v57, %v684_v56 }
 0x1e0   : > { %v719_v61 = vpack.c.bf16 %v687_v59, %v685_v58 }
 0x1e2   : > { %1007 = vmatprep.mubr.bf16.mxu1 %v719_v61 }
 0x1e3   : > { %1008 = vmatmul.mubr.bf16.gmra.mrb[60].mxu1 %v718_v60 }
 0x23e   : > { %v1223_v62 = vpop.f32.mrb[0].mxu1 }
 0x23f   : > { %v1224_v23 = vpop.f32.mrb[1].mxu1 }
 0x240   : > { %v1225_v1 = vadd.f32 %v1224_v23, %v1223_v62  ;;  %v1226_v2 = vpop.f32.mrb[2].mxu1 }
 0x241   : > { %v1227_v3 = vpop.f32.mrb[3].mxu1 }
 0x242   : > { %v890_v24 = vadd.f32 %v1225_v1, %v1940_v63  ;;  %v1228_v4 = vadd.f32 %v1227_v3, %v1226_v2 }
 0x244   : > { %1016 = vst [vmem:[%s1945_s28] sm:$0xff] %v890_v24  ;;  %v893_v5 = vadd.f32 %v1228_v4, %v1940_v63 }
 0x246   : > { %1017 = vst [vmem:[%s1945_s28 + $0x8] sm:$0xff] %v893_v5  ;;  %v1229_v6 = vpop.f32.mrb[4].mxu1 }
 0x247   : > { %v1230_v7 = vpop.f32.mrb[5].mxu1 }
 0x248   : > { %v1231_v8 = vadd.f32 %v1230_v7, %v1229_v6  ;;  %v1232_v9 = vpop.f32.mrb[6].mxu1 }
 0x249   : > { %v1233_v10 = vpop.f32.mrb[7].mxu1 }
 0x24a   : > { %v898_v11 = vadd.f32 %v1231_v8, %v1940_v63  ;;  %v1234_v12 = vadd.f32 %v1233_v10, %v1232_v9 }
 0x24c   : > { %1018 = vst [vmem:[%s1945_s28 + $0x10] sm:$0xff] %v898_v11  ;;  %v901_v13 = vadd.f32 %v1234_v12, %v1940_v63 }
 0x24e   : > { %1019 = vst [vmem:[%s1945_s28 + $0x18] sm:$0xff] %v901_v13  ;;  %v1235_v14 = vpop.f32.mrb[8].mxu1 }
 0x24f   : > { %v1236_v15 = vpop.f32.mrb[9].mxu1 }
 0x250   : > { %v1237_v16 = vadd.f32 %v1236_v15, %v1235_v14  ;;  %v1238_v17 = vpop.f32.mrb[10].mxu1 }
 0x251   : > { %v1239_v18 = vpop.f32.mrb[11].mxu1 }
 0x252   : > { %v906_v19 = vadd.f32 %v1237_v16, %v1940_v63  ;;  %v1240_v20 = vadd.f32 %v1239_v18, %v1238_v17 }
 0x254   : > { %1020 = vst [vmem:[%s1945_s28 + $0x20] sm:$0xff] %v906_v19  ;;  %v909_v21 = vadd.f32 %v1240_v20, %v1940_v63 }
 0x256   : > { %1021 = vst [vmem:[%s1945_s28 + $0x28] sm:$0xff] %v909_v21  ;;  %v1241_v22 = vpop.f32.mrb[12].mxu1 }
 0x257   : > { %v1242_v25 = vpop.f32.mrb[13].mxu1 }
 0x258   : > { %v1243_v26 = vadd.f32 %v1242_v25, %v1241_v22  ;;  %v1244_v0 = vpop.f32.mrb[14].mxu1 }
 0x259   : > { %v1245_v27 = vpop.f32.mrb[15].mxu1 }
 0x25a   : > { %v914_v28 = vadd.f32 %v1243_v26, %v1940_v63  ;;  %v1246_v29 = vadd.f32 %v1245_v27, %v1244_v0 }
 0x25c   : > { %1022 = vst [vmem:[%s1945_s28 + $0x30] sm:$0xff] %v914_v28  ;;  %v917_v30 = vadd.f32 %v1246_v29, %v1940_v63 }
 0x25e   : > { %1023 = vst [vmem:[%s1945_s28 + $0x38] sm:$0xff] %v917_v30  ;;  %v1247_v31 = vpop.f32.mrb[16].mxu1 }
 0x25f   : > { %v1248_v32 = vpop.f32.mrb[17].mxu1 }
 0x260   : > { %v1249_v33 = vadd.f32 %v1248_v32, %v1247_v31  ;;  %v1250_v34 = vpop.f32.mrb[18].mxu1 }
 0x261   : > { %v1251_v35 = vpop.f32.mrb[19].mxu1 }
 0x262   : > { %v922_v36 = vadd.f32 %v1249_v33, %v1940_v63  ;;  %v1252_v37 = vadd.f32 %v1251_v35, %v1250_v34 }
 0x264   : > { %1024 = vst [vmem:[%s1945_s28 + $0x40] sm:$0xff] %v922_v36  ;;  %v925_v38 = vadd.f32 %v1252_v37, %v1940_v63 }
 0x266   : > { %1025 = vst [vmem:[%s1945_s28 + $0x48] sm:$0xff] %v925_v38  ;;  %v1253_v39 = vpop.f32.mrb[20].mxu1 }
 0x267   : > { %v1254_v40 = vpop.f32.mrb[21].mxu1 }
 0x268   : > { %v1255_v41 = vadd.f32 %v1254_v40, %v1253_v39  ;;  %v1256_v42 = vpop.f32.mrb[22].mxu1 }
 0x269   : > { %v1257_v43 = vpop.f32.mrb[23].mxu1 }
 0x26a   : > { %v930_v44 = vadd.f32 %v1255_v41, %v1940_v63  ;;  %v1258_v45 = vadd.f32 %v1257_v43, %v1256_v42 }
 0x26c   : > { %1026 = vst [vmem:[%s1945_s28 + $0x50] sm:$0xff] %v930_v44  ;;  %v933_v46 = vadd.f32 %v1258_v45, %v1940_v63 }
 0x26e   : > { %1027 = vst [vmem:[%s1945_s28 + $0x58] sm:$0xff] %v933_v46  ;;  %v1259_v47 = vpop.f32.mrb[24].mxu1 }
 0x26f   : > { %v1260_v48 = vpop.f32.mrb[25].mxu1 }
 0x270   : > { %v1261_v49 = vadd.f32 %v1260_v48, %v1259_v47  ;;  %v1262_v50 = vpop.f32.mrb[26].mxu1 }
 0x271   : > { %v1263_v51 = vpop.f32.mrb[27].mxu1 }
 0x272   : > { %v938_v52 = vadd.f32 %v1261_v49, %v1940_v63  ;;  %v1264_v53 = vadd.f32 %v1263_v51, %v1262_v50 }
 0x274   : > { %1028 = vst [vmem:[%s1945_s28 + $0x60] sm:$0xff] %v938_v52  ;;  %v941_v54 = vadd.f32 %v1264_v53, %v1940_v63 }
 0x276   : > { %1029 = vst [vmem:[%s1945_s28 + $0x68] sm:$0xff] %v941_v54  ;;  %v1265_v55 = vpop.f32.mrb[28].mxu1 }
 0x277   : > { %v1266_v56 = vpop.f32.mrb[29].mxu1 }
 0x278   : > { %v1267_v57 = vadd.f32 %v1266_v56, %v1265_v55  ;;  %v1268_v58 = vpop.f32.mrb[30].mxu1 }
 0x279   : > { %v1269_v59 = vpop.f32.mrb[31].mxu1 }
 0x27a   : > { %v946_v60 = vadd.f32 %v1267_v57, %v1940_v63  ;;  %v1270_v61 = vadd.f32 %v1269_v59, %v1268_v58 }
 0x27c   : > { %1030 = vst [vmem:[%s1945_s28 + $0x70] sm:$0xff] %v946_v60  ;;  %v949_v62 = vadd.f32 %v1270_v61, %v1940_v63 }
 0x27e   : > { %1031 = vst [vmem:[%s1945_s28 + $0x78] sm:$0xff] %v949_v62  ;;  %v1271_v23 = vpop.f32.mrb[32].mxu1 }
 0x27f   : > { %v1272_v1 = vpop.f32.mrb[33].mxu1 }
 0x280   : > { %v1273_v2 = vadd.f32 %v1272_v1, %v1271_v23  ;;  %v1274_v3 = vpop.f32.mrb[34].mxu1 }
 0x281   : > { %v1275_v24 = vpop.f32.mrb[35].mxu1 }
 0x282   : > { %v954_v4 = vadd.f32 %v1273_v2, %v1940_v63  ;;  %v1276_v5 = vadd.f32 %v1275_v24, %v1274_v3 }
 0x284   : > { %1032 = vst [vmem:[%s1945_s28 + $0x80] sm:$0xff] %v954_v4  ;;  %v957_v6 = vadd.f32 %v1276_v5, %v1940_v63 }
 0x286   : > { %1033 = vst [vmem:[%s1945_s28 + $0x88] sm:$0xff] %v957_v6  ;;  %v1277_v7 = vpop.f32.mrb[36].mxu1 }
 0x287   : > { %v1278_v8 = vpop.f32.mrb[37].mxu1 }
 0x288   : > { %v1279_v9 = vadd.f32 %v1278_v8, %v1277_v7  ;;  %v1280_v10 = vpop.f32.mrb[38].mxu1 }
 0x289   : > { %v1281_v11 = vpop.f32.mrb[39].mxu1 }
 0x28a   : > { %v962_v12 = vadd.f32 %v1279_v9, %v1940_v63  ;;  %v1282_v13 = vadd.f32 %v1281_v11, %v1280_v10 }
 0x28c   : > { %1034 = vst [vmem:[%s1945_s28 + $0x90] sm:$0xff] %v962_v12  ;;  %v965_v14 = vadd.f32 %v1282_v13, %v1940_v63 }
 0x28e   : > { %1035 = vst [vmem:[%s1945_s28 + $0x98] sm:$0xff] %v965_v14  ;;  %v1283_v15 = vpop.f32.mrb[40].mxu1 }
 0x28f   : > { %v1284_v16 = vpop.f32.mrb[41].mxu1 }
 0x290   : > { %v1285_v17 = vadd.f32 %v1284_v16, %v1283_v15  ;;  %v1286_v18 = vpop.f32.mrb[42].mxu1 }
 0x291   : > { %v1287_v19 = vpop.f32.mrb[43].mxu1 }
 0x292   : > { %v970_v20 = vadd.f32 %v1285_v17, %v1940_v63  ;;  %v1288_v21 = vadd.f32 %v1287_v19, %v1286_v18 }
 0x294   : > { %1036 = vst [vmem:[%s1945_s28 + $0xa0] sm:$0xff] %v970_v20  ;;  %v973_v22 = vadd.f32 %v1288_v21, %v1940_v63 }
 0x296   : > { %1037 = vst [vmem:[%s1945_s28 + $0xa8] sm:$0xff] %v973_v22  ;;  %v1289_v25 = vpop.f32.mrb[44].mxu1 }
 0x297   : > { %v1290_v26 = vpop.f32.mrb[45].mxu1 }
 0x298   : > { %v1291_v0 = vadd.f32 %v1290_v26, %v1289_v25  ;;  %v1292_v27 = vpop.f32.mrb[46].mxu1 }
 0x299   : > { %v1293_v28 = vpop.f32.mrb[47].mxu1 }
 0x29a   : > { %v978_v29 = vadd.f32 %v1291_v0, %v1940_v63  ;;  %v1294_v30 = vadd.f32 %v1293_v28, %v1292_v27 }
 0x29c   : > { %1038 = vst [vmem:[%s1945_s28 + $0xb0] sm:$0xff] %v978_v29  ;;  %v981_v31 = vadd.f32 %v1294_v30, %v1940_v63 }
 0x29e   : > { %1039 = vst [vmem:[%s1945_s28 + $0xb8] sm:$0xff] %v981_v31  ;;  %v1295_v32 = vpop.f32.mrb[48].mxu1 }
 0x29f   : > { %v1296_v33 = vpop.f32.mrb[49].mxu1 }
 0x2a0   : > { %v1297_v34 = vadd.f32 %v1296_v33, %v1295_v32  ;;  %v1298_v35 = vpop.f32.mrb[50].mxu1 }
 0x2a1   : > { %v1299_v36 = vpop.f32.mrb[51].mxu1 }
 0x2a2   : > { %v986_v37 = vadd.f32 %v1297_v34, %v1940_v63  ;;  %v1300_v38 = vadd.f32 %v1299_v36, %v1298_v35 }
 0x2a4   : > { %1040 = vst [vmem:[%s1945_s28 + $0xc0] sm:$0xff] %v986_v37  ;;  %v989_v39 = vadd.f32 %v1300_v38, %v1940_v63 }
 0x2a6   : > { %1041 = vst [vmem:[%s1945_s28 + $0xc8] sm:$0xff] %v989_v39  ;;  %v1301_v40 = vpop.f32.mrb[52].mxu1 }
 0x2a7   : > { %v1302_v41 = vpop.f32.mrb[53].mxu1 }
 0x2a8   : > { %v1303_v42 = vadd.f32 %v1302_v41, %v1301_v40  ;;  %v1304_v43 = vpop.f32.mrb[54].mxu1 }
 0x2a9   : > { %v1305_v44 = vpop.f32.mrb[55].mxu1 }
 0x2aa   : > { %v994_v45 = vadd.f32 %v1303_v42, %v1940_v63  ;;  %v1306_v46 = vadd.f32 %v1305_v44, %v1304_v43 }
 0x2ac   : > { %1042 = vst [vmem:[%s1945_s28 + $0xd0] sm:$0xff] %v994_v45  ;;  %v997_v47 = vadd.f32 %v1306_v46, %v1940_v63 }
 0x2ae   : > { %1043 = vst [vmem:[%s1945_s28 + $0xd8] sm:$0xff] %v997_v47  ;;  %v1307_v48 = vpop.f32.mrb[56].mxu1 }
 0x2af   : > { %v1308_v49 = vpop.f32.mrb[57].mxu1 }
 0x2b0   : > { %v1309_v50 = vadd.f32 %v1308_v49, %v1307_v48  ;;  %v1310_v51 = vpop.f32.mrb[58].mxu1 }
 0x2b1   : > { %v1311_v52 = vpop.f32.mrb[59].mxu1 }
 0x2b2   : > { %v1002_v53 = vadd.f32 %v1309_v50, %v1940_v63  ;;  %v1312_v54 = vadd.f32 %v1311_v52, %v1310_v51 }
 0x2b4   : > { %1044 = vst [vmem:[%s1945_s28 + $0xe0] sm:$0xff] %v1002_v53  ;;  %v1005_v55 = vadd.f32 %v1312_v54, %v1940_v63 }
 0x2b6   : > { %1045 = vst [vmem:[%s1945_s28 + $0xe8] sm:$0xff] %v1005_v55  ;;  %v1313_v56 = vpop.f32.mrb[60].mxu1 }
 0x2b7   : > { %v1314_v57 = vpop.f32.mrb[61].mxu1 }
 0x2b8   : > { %v1315_v58 = vadd.f32 %v1314_v57, %v1313_v56  ;;  %v1316_v59 = vpop.f32.mrb[62].mxu1 }
 0x2b9   : > { %v1317_v60 = vpop.f32.mrb[63].mxu1 }
 0x2ba   : > { %v1010_v61 = vadd.f32 %v1315_v58, %v1940_v63  ;;  %v1318_v62 = vadd.f32 %v1317_v60, %v1316_v59 }
 0x2bc   : > { %1046 = vst [vmem:[%s1945_s28 + $0xf0] sm:$0xff] %v1010_v61  ;;  %v1013_v23 = vadd.f32 %v1318_v62, %v1940_v63 }
 0x2be   : > { %1047 = vst [vmem:[%s1945_s28 + $0xf8] sm:$0xff] %v1013_v23 }
 0x2bf   : > { %1532 = shalt.err (!%p1529_p7)
}
 0x2c0   : > { %s1533_s14 = scalar_lea.hbm %s2012_s12, 4096  ;;  %s1537_s15 = scalar_lea.hbm %s2065_s5, 16384 }
 0x2c1   : > { %p1534_p9 = scmp.ne.s32.totalorder %s2012_s12, %s1533_s14  ;;  %p1538_p5 = scmp.lt.u32.totalorder %s2012_s12, %s2065_s5 }
 0x2c2   : > { %p1539_p10 = scmp.lt.u32.totalorder %s1537_s15, %s1533_s14  ;;  %p1541_p2 = scmp.lt.u32.totalorder %s1533_s14, %s2012_s12 }
 0x2c3   : > { %p1535_p12 = pnand %p1534_p9, %p1750_p8 }
 0x2c4   : > { %p1540_p1 = por %p1539_p10, %p1538_p5 }
 0x2c5   : > { %p1536_p0 = pneg %p1535_p12 }
 0x2c6   : > { %p1542_p4 = por %p1541_p2, %p1540_p1 }
 0x2c8   : > { %p1543_p6 = pnand %p1542_p4, %p1536_p0 }
 0x2ca   : > { %1546 = shalt.err (!%p1543_p6)
}
 0x2cb   : > { %s1600_s13 = smov 128   ;;  %s1601_s11 = smov 8  }
 0x2cc   : > { %1329 = dma.vmem_to_hbm [thread:$0]  (%p1750_p8), %s2014_s17, 4096, %s2012_s12, %s1049_s22, %s1600_s13, %s1600_s13, %s1601_s11  }
 0x2cd PF: > { %p1351_p11 = scmp.ge.s32.totalorder %s1589_s21, 2  ;;  %s1077_s29 = sand.u32 1, %s1577_s18  }
 0x2ce   : > { %p2080_p13 = scmp.ne.s32.totalorder %s2070_s25, 0  ;;  %s1078_s30 = scalar_lea.sflag [#allocation4], %s1077_s29 }
 0x2d0   : > { %p1343_p3 = pnand %p1351_p11, %p2080_p13 }
 0x2d2   : > { %1572 = dma.done.wait (!%p1343_p3), %s1078_s30, 4096  }
 0x2d3   : > { %1574 = vsyncadd (!%p1343_p3), %s1078_s30, 4294963200  ;;  %p19_p7 = scmp.ge.s32.totalorder %s1737_s23, 6   ;;  %s2081_s18 = smov %s1581_s19 }
 0x2d4   : > { %s2082_s19 = smov %s1585_s20  ;;  %s2083_s20 = smov %s1746_s7 }
 0x2d5   : > { %s2084_s21 = smov %s1737_s23  ;;  %21 = sbr.rel (!%p19_p7) target bundleno = 6 (0x6), region = 93 }
 0x2dc   :  { %1083 = vsyncpa [#allocation3], 1 }
 0x2dd   :  { %1085 = vsyncpa [#allocation3 + $0x1], 1 }
 0x2de   :  { %1086 = vsyncpa [#allocation6], 1 }
 0x2df   :  { %1087 = vsyncpa [#allocation4], 1 }
 0x2e0   :  { %1089 = vsyncpa [#allocation4 + $0x1], 1 }

</bundles_post_ra>
